<compile_context>
chip_gen: v5e
topology: v5e:2x2
jax: 0.10.0
libtpu: 0.0.40
codegen_flags: <defaults>
</compile_context>

<pallas_src>
import math

import jax
import jax.numpy as jnp
from jax.experimental import pallas as pl
from jax.experimental.pallas import tpu as pltpu


# ----------------------------------------------------------------------------- kernel


def gcn_kernel(x_ref, r1_ref, b1_ref, b2_ref, r2_ref, out_ref):
    # x_ref  : (1, Hp, W*Cp)   one batch element, zero-padded along H, channels
    #                          zero-padded to Cp, lanes = (w, c) flattened (lane-dense)
    # r1_ref : (k*W*Cp, W*Cp)  im2col weights of conv1[0]  ((k,1) conv along H)
    # b1_ref : (W*Cp, W*Cp)    banded weights of conv1[1]  ((1,k) conv along W)
    # b2_ref : (W*Cp, W*Cp)    banded weights of conv2[0]  ((1,k) conv along W)
    # r2_ref : (k*W*Cp, W*Cp)  im2col weights of conv2[1]  ((k,1) conv along H)
    # out_ref: (1, H, W*Cp)
    wc = x_ref.shape[2]
    h = out_ref.shape[1]
    k = r1_ref.shape[0] // wc

    x = x_ref[0]                                                     # (Hp, W*Cp)

    # ---- path A: (k,1) conv along H as ONE im2col matmul, then (1,k) conv ----
    patches = jnp.concatenate([x[t:t + h, :] for t in range(k)], axis=1)      # (H, k*W*Cp)
    ya = jnp.dot(patches, r1_ref[...], preferred_element_type=jnp.float32)    # (H, W*Cp)
    x1 = jnp.dot(ya, b1_ref[...], preferred_element_type=jnp.float32)         # (H, W*Cp)

    # ---- path B: (1,k) conv along W first (row-wise, so the zero H-halo rows
    #      stay zero), then (k,1) conv along H as ONE im2col matmul ----
    yb = jnp.dot(x, b2_ref[...], preferred_element_type=jnp.float32)          # (Hp, W*Cp)
    pb = jnp.concatenate([yb[t:t + h, :] for t in range(k)], axis=1)          # (H, k*W*Cp)
    x2 = jnp.dot(pb, r2_ref[...], preferred_element_type=jnp.float32)         # (H, W*Cp)

    out_ref[0] = (x1 + x2).astype(out_ref.dtype)


# ----------------------------------------------------------------------------- weight packing


def _round_up(x, m):
    return (x + m - 1) // m * m


def _padded_channels(c_in, c_out, w):
    """Smallest Cp >= max(c_in, c_out) such that w * Cp is a multiple of 128."""
    base = max(c_in, c_out)
    step = 128 // math.gcd(w, 128)
    return _round_up(base, step)


def _banded_w_matrix(taps, size, pad, cp, dtype=jnp.float32):
    """(1,k) conv along W as a single matmul.

    taps: (k, Ci, Co).  Returns B of shape (size*cp, size*cp) with
    B[(w_in, ci), (w_out, co)] = taps[w_in - w_out + pad, ci, co] inside the band,
    0 outside (which reproduces the zero "same" padding).
    """
    k, ci, co = taps.shape
    tp = jnp.zeros((k, cp, cp), dtype).at[:, :ci, :co].set(taps.astype(dtype))
    w_in = jnp.arange(size)[:, None]
    w_out = jnp.arange(size)[None, :]
    t = w_in - w_out + pad
    valid = (t >= 0) & (t < k)
    a = tp[jnp.clip(t, 0, k - 1)] * valid[:, :, None, None].astype(dtype)  # (size,size,cp,cp)
    return a.transpose(0, 2, 1, 3).reshape(size * cp, size * cp)


def _stacked_h_matrix(taps, w_size, cp, dtype=jnp.float32):
    """(k,1) conv along H as a single im2col matmul.

    taps: (k, Ci, Co).  Returns R of shape (k*w_size*cp, w_size*cp) with
    R[(t, w_in, ci), (w_out, co)] = [w_in == w_out] * taps[t, ci, co].
    """
    k, ci, co = taps.shape
    tp = jnp.zeros((k, cp, cp), dtype).at[:, :ci, :co].set(taps.astype(dtype))
    eye = jnp.eye(w_size, dtype=dtype)
    r = jnp.einsum("wv,tab->twavb", eye, tp)        # (k, w_in, ci, w_out, co)
    return r.reshape(k * w_size * cp, w_size * cp)


# ----------------------------------------------------------------------------- forward


@jax.jit
def gcn_forward(x_nchw, k1a, k1b, k2a, k2b):
    """GCNconv forward.

    x_nchw : (N, C_in, H, W)
    k1a    : (k, C_in, Cc)  taps of conv1[0]  (kernel (k,1), conv along H)
    k1b    : (k, Cc,  Cc)   taps of conv1[1]  (kernel (1,k), conv along W)
    k2a    : (k, C_in, Cc)  taps of conv2[0]  (kernel (1,k), conv along W)
    k2b    : (k, Cc,  Cc)   taps of conv2[1]  (kernel (k,1), conv along H)
    returns (N, Cc, H, W)
    """
    n, c_in, h, w = x_nchw.shape
    k = k1a.shape[0]
    cc = k1a.shape[2]
    pad = (k - 1) // 2

    cp = _padded_channels(c_in, cc, w)            # channel padding -> lane-dense rows
    wc = w * cp
    hp = _round_up(h + 2 * pad, 8)                # pad H rows up to a sublane multiple

    # NCHW -> NHWC, zero-pad channels to cp and H by `pad` (+ sublane round-up),
    # flatten (w, c) onto the lane axis.
    x = jnp.transpose(x_nchw, (0, 2, 3, 1)).astype(jnp.float32)         # (N, H, W, C_in)
    x = jnp.pad(x, ((0, 0), (pad, pad + (hp - (h + 2 * pad))), (0, 0), (0, cp - c_in)))
    x2d = x.reshape(n, hp, wc)                                          # (N, Hp, W*Cp)

    # Pack the four conv weights once (pure weight transform).
    r1 = _stacked_h_matrix(k1a, w, cp)            # path A, (k,1) conv
    b1 = _banded_w_matrix(k1b, w, pad, cp)        # path A, (1,k) conv
    b2 = _banded_w_matrix(k2a, w, pad, cp)        # path B, (1,k) conv
    r2 = _stacked_h_matrix(k2b, w, cp)            # path B, (k,1) conv

    out2d = pl.pallas_call(
        gcn_kernel,
        out_shape=jax.ShapeDtypeStruct((n, h, wc), jnp.float32),
        grid=(n,),
        in_specs=[
            pl.BlockSpec((1, hp, wc), lambda i: (i, 0, 0)),
            pl.BlockSpec((k * wc, wc), lambda i: (0, 0)),
            pl.BlockSpec((wc, wc), lambda i: (0, 0)),
            pl.BlockSpec((wc, wc), lambda i: (0, 0)),
            pl.BlockSpec((k * wc, wc), lambda i: (0, 0)),
        ],
        out_specs=pl.BlockSpec((1, h, wc), lambda i: (i, 0, 0)),
        compiler_params=pltpu.CompilerParams(
            dimension_semantics=("parallel",)),
    )(x2d, r1, b1, b2, r2)

    out = out2d.reshape(n, h, w, cp)[:, :, :, :cc]                      # drop channel pad
    return jnp.transpose(out, (0, 3, 1, 2))                             # NHWC -> NCHW


# ----------------------------------------------------------------------------- reference


def gcn_reference(x_nchw, k1a, k1b, k2a, k2b):
    """Pure-JAX reference using lax convolutions (NCHW / OIHW, cross-correlation)."""
    hi = jax.lax.Precision.HIGHEST
    pad = (k1a.shape[0] - 1) // 2
    dn = ("NCHW", "OIHW", "NCHW")

    def conv(inp, w_oihw, padding):
        return jax.lax.conv_general_dilated(
            inp, w_oihw, (1, 1), padding, dimension_numbers=dn, precision=hi)

    w1a = jnp.transpose(k1a, (2, 1, 0))[:, :, :, None]   # (Cc, Cin, k, 1)
    w1b = jnp.transpose(k1b, (2, 1, 0))[:, :, None, :]   # (Cc, Cc, 1, k)
    w2a = jnp.transpose(k2a, (2, 1, 0))[:, :, None, :]   # (Cc, Cin, 1, k)
    w2b = jnp.transpose(k2b, (2, 1, 0))[:, :, :, None]   # (Cc, Cc, k, 1)

    x1 = conv(conv(x_nchw, w1a, ((pad, pad), (0, 0))), w1b, ((0, 0), (pad, pad)))
    x2 = conv(conv(x_nchw, w2a, ((0, 0), (pad, pad))), w2b, ((pad, pad), (0, 0)))
    return x1 + x2


# ----------------------------------------------------------------------------- demo


if __name__ == "__main__":
    key = jax.random.PRNGKey(0)
    kx, kw1, kw2, kw3, kw4 = jax.random.split(key, 5)

    N, C_IN, H, W = 2, 4, 16, 16
    NUM_CLASSES = 4
    K = 15                                  # module default kernel size, pad = 7

    x = jax.random.normal(kx, (N, C_IN, H, W), dtype=jnp.float32)
    # Conv weights stored as (k, C_in, C_out) taps, same parameter family as
    # nn.Conv2d(..., kernel_size=(k,1)/(1,k), padding='same'-style, bias=False).
    k1a = jax.random.normal(kw1, (K, C_IN, NUM_CLASSES), jnp.float32) * 0.1
    k1b = jax.random.normal(kw2, (K, NUM_CLASSES, NUM_CLASSES), jnp.float32) * 0.1
    k2a = jax.random.normal(kw3, (K, C_IN, NUM_CLASSES), jnp.float32) * 0.1
    k2b = jax.random.normal(kw4, (K, NUM_CLASSES, NUM_CLASSES), jnp.float32) * 0.1

    out = gcn_forward(x, k1a, k1b, k2a, k2b)
    out = jax.block_until_ready(out)

    ref = gcn_reference(x, k1a, k1b, k2a, k2b)
    assert out.shape == (N, NUM_CLASSES, H, W)
    assert jnp.allclose(out, ref, atol=1e-3, rtol=1e-3), "mismatch vs reference"

    print("KERNEL_OK")
</pallas_src>

<mosaic_0001>
module attributes {stable_mosaic.version = 11 : i64} {
  func.func @gcn_kernel(%arg0: i32, %arg1: memref<1x32x128xf32, #tpu.memory_space<vmem>>, %arg2: memref<1920x128xf32, #tpu.memory_space<vmem>>, %arg3: memref<128x128xf32, #tpu.memory_space<vmem>>, %arg4: memref<128x128xf32, #tpu.memory_space<vmem>>, %arg5: memref<1920x128xf32, #tpu.memory_space<vmem>>, %arg6: memref<1x16x128xf32, #tpu.memory_space<vmem>>) attributes {dimension_semantics = [#tpu.dimension_semantics<parallel>], iteration_bounds = array<i64: 2>, scalar_prefetch = 0 : i64, scratch_operands = 0 : i64, tpu.core_type = #tpu.core_type<tc>, window_params = [{transform_indices = @transform_0, window_bounds = array<i64: 1, 32, 128>}, {pipeline_mode = #tpu.pipeline_mode<synchronous>, transform_indices = @transform_1, window_bounds = array<i64: 1920, 128>}, {pipeline_mode = #tpu.pipeline_mode<synchronous>, transform_indices = @transform_2, window_bounds = array<i64: 128, 128>}, {pipeline_mode = #tpu.pipeline_mode<synchronous>, transform_indices = @transform_3, window_bounds = array<i64: 128, 128>}, {pipeline_mode = #tpu.pipeline_mode<synchronous>, transform_indices = @transform_4, window_bounds = array<i64: 1920, 128>}, {transform_indices = @transform_5, window_bounds = array<i64: 1, 16, 128>}]} {
    %c0 = arith.constant 0 : index
    %c0_0 = arith.constant 0 : index
    %c0_1 = arith.constant 0 : index
    %0 = vector.load %arg1[%c0, %c0_0, %c0_1] : memref<1x32x128xf32, #tpu.memory_space<vmem>>, vector<1x32x128xf32>
    %1 = vector.shape_cast %0 : vector<1x32x128xf32> to vector<32x128xf32>
    %2 = vector.extract_strided_slice %1 {offsets = [0, 0], sizes = [16, 128], strides = [1, 1]} : vector<32x128xf32> to vector<16x128xf32>
    %3 = vector.extract_strided_slice %1 {offsets = [1, 0], sizes = [16, 128], strides = [1, 1]} : vector<32x128xf32> to vector<16x128xf32>
    %4 = vector.extract_strided_slice %1 {offsets = [2, 0], sizes = [16, 128], strides = [1, 1]} : vector<32x128xf32> to vector<16x128xf32>
    %5 = vector.extract_strided_slice %1 {offsets = [3, 0], sizes = [16, 128], strides = [1, 1]} : vector<32x128xf32> to vector<16x128xf32>
    %6 = vector.extract_strided_slice %1 {offsets = [4, 0], sizes = [16, 128], strides = [1, 1]} : vector<32x128xf32> to vector<16x128xf32>
    %7 = vector.extract_strided_slice %1 {offsets = [5, 0], sizes = [16, 128], strides = [1, 1]} : vector<32x128xf32> to vector<16x128xf32>
    %8 = vector.extract_strided_slice %1 {offsets = [6, 0], sizes = [16, 128], strides = [1, 1]} : vector<32x128xf32> to vector<16x128xf32>
    %9 = vector.extract_strided_slice %1 {offsets = [7, 0], sizes = [16, 128], strides = [1, 1]} : vector<32x128xf32> to vector<16x128xf32>
    %10 = vector.extract_strided_slice %1 {offsets = [8, 0], sizes = [16, 128], strides = [1, 1]} : vector<32x128xf32> to vector<16x128xf32>
    %11 = vector.extract_strided_slice %1 {offsets = [9, 0], sizes = [16, 128], strides = [1, 1]} : vector<32x128xf32> to vector<16x128xf32>
    %12 = vector.extract_strided_slice %1 {offsets = [10, 0], sizes = [16, 128], strides = [1, 1]} : vector<32x128xf32> to vector<16x128xf32>
    %13 = vector.extract_strided_slice %1 {offsets = [11, 0], sizes = [16, 128], strides = [1, 1]} : vector<32x128xf32> to vector<16x128xf32>
    %14 = vector.extract_strided_slice %1 {offsets = [12, 0], sizes = [16, 128], strides = [1, 1]} : vector<32x128xf32> to vector<16x128xf32>
    %15 = vector.extract_strided_slice %1 {offsets = [13, 0], sizes = [16, 128], strides = [1, 1]} : vector<32x128xf32> to vector<16x128xf32>
    %16 = vector.extract_strided_slice %1 {offsets = [14, 0], sizes = [16, 128], strides = [1, 1]} : vector<32x128xf32> to vector<16x128xf32>
    %17 = tpu.concatenate %2, %3, %4, %5, %6, %7, %8, %9, %10, %11, %12, %13, %14, %15, %16 in 1 : vector<16x128xf32>, vector<16x128xf32>, vector<16x128xf32>, vector<16x128xf32>, vector<16x128xf32>, vector<16x128xf32>, vector<16x128xf32>, vector<16x128xf32>, vector<16x128xf32>, vector<16x128xf32>, vector<16x128xf32>, vector<16x128xf32>, vector<16x128xf32>, vector<16x128xf32>, vector<16x128xf32> -> vector<16x1920xf32>
    %c0_2 = arith.constant 0 : index
    %c0_3 = arith.constant 0 : index
    %18 = vector.load %arg2[%c0_2, %c0_3] : memref<1920x128xf32, #tpu.memory_space<vmem>>, vector<1920x128xf32>
    %cst = arith.constant dense<0.000000e+00> : vector<16x128xf32>
    %19 = tpu.matmul %17, %18, %cst {dimension_numbers = #tpu.dot_dimension_numbers<[1], [0], [0], [1], [0, 0, 1, 1], [], []>} : vector<16x1920xf32>, vector<1920x128xf32>, vector<16x128xf32> -> vector<16x128xf32>
    %c0_4 = arith.constant 0 : index
    %c0_5 = arith.constant 0 : index
    %20 = vector.load %arg3[%c0_4, %c0_5] : memref<128x128xf32, #tpu.memory_space<vmem>>, vector<128x128xf32>
    %cst_6 = arith.constant dense<0.000000e+00> : vector<16x128xf32>
    %21 = tpu.matmul %19, %20, %cst_6 {dimension_numbers = #tpu.dot_dimension_numbers<[1], [0], [0], [1], [0, 0, 1, 1], [], []>} : vector<16x128xf32>, vector<128x128xf32>, vector<16x128xf32> -> vector<16x128xf32>
    %c0_7 = arith.constant 0 : index
    %c0_8 = arith.constant 0 : index
    %22 = vector.load %arg4[%c0_7, %c0_8] : memref<128x128xf32, #tpu.memory_space<vmem>>, vector<128x128xf32>
    %cst_9 = arith.constant dense<0.000000e+00> : vector<32x128xf32>
    %23 = tpu.matmul %1, %22, %cst_9 {dimension_numbers = #tpu.dot_dimension_numbers<[1], [0], [0], [1], [0, 0, 1, 1], [], []>} : vector<32x128xf32>, vector<128x128xf32>, vector<32x128xf32> -> vector<32x128xf32>
    %24 = vector.extract_strided_slice %23 {offsets = [0, 0], sizes = [16, 128], strides = [1, 1]} : vector<32x128xf32> to vector<16x128xf32>
    %25 = vector.extract_strided_slice %23 {offsets = [1, 0], sizes = [16, 128], strides = [1, 1]} : vector<32x128xf32> to vector<16x128xf32>
    %26 = vector.extract_strided_slice %23 {offsets = [2, 0], sizes = [16, 128], strides = [1, 1]} : vector<32x128xf32> to vector<16x128xf32>
    %27 = vector.extract_strided_slice %23 {offsets = [3, 0], sizes = [16, 128], strides = [1, 1]} : vector<32x128xf32> to vector<16x128xf32>
    %28 = vector.extract_strided_slice %23 {offsets = [4, 0], sizes = [16, 128], strides = [1, 1]} : vector<32x128xf32> to vector<16x128xf32>
    %29 = vector.extract_strided_slice %23 {offsets = [5, 0], sizes = [16, 128], strides = [1, 1]} : vector<32x128xf32> to vector<16x128xf32>
    %30 = vector.extract_strided_slice %23 {offsets = [6, 0], sizes = [16, 128], strides = [1, 1]} : vector<32x128xf32> to vector<16x128xf32>
    %31 = vector.extract_strided_slice %23 {offsets = [7, 0], sizes = [16, 128], strides = [1, 1]} : vector<32x128xf32> to vector<16x128xf32>
    %32 = vector.extract_strided_slice %23 {offsets = [8, 0], sizes = [16, 128], strides = [1, 1]} : vector<32x128xf32> to vector<16x128xf32>
    %33 = vector.extract_strided_slice %23 {offsets = [9, 0], sizes = [16, 128], strides = [1, 1]} : vector<32x128xf32> to vector<16x128xf32>
    %34 = vector.extract_strided_slice %23 {offsets = [10, 0], sizes = [16, 128], strides = [1, 1]} : vector<32x128xf32> to vector<16x128xf32>
    %35 = vector.extract_strided_slice %23 {offsets = [11, 0], sizes = [16, 128], strides = [1, 1]} : vector<32x128xf32> to vector<16x128xf32>
    %36 = vector.extract_strided_slice %23 {offsets = [12, 0], sizes = [16, 128], strides = [1, 1]} : vector<32x128xf32> to vector<16x128xf32>
    %37 = vector.extract_strided_slice %23 {offsets = [13, 0], sizes = [16, 128], strides = [1, 1]} : vector<32x128xf32> to vector<16x128xf32>
    %38 = vector.extract_strided_slice %23 {offsets = [14, 0], sizes = [16, 128], strides = [1, 1]} : vector<32x128xf32> to vector<16x128xf32>
    %39 = tpu.concatenate %24, %25, %26, %27, %28, %29, %30, %31, %32, %33, %34, %35, %36, %37, %38 in 1 : vector<16x128xf32>, vector<16x128xf32>, vector<16x128xf32>, vector<16x128xf32>, vector<16x128xf32>, vector<16x128xf32>, vector<16x128xf32>, vector<16x128xf32>, vector<16x128xf32>, vector<16x128xf32>, vector<16x128xf32>, vector<16x128xf32>, vector<16x128xf32>, vector<16x128xf32>, vector<16x128xf32> -> vector<16x1920xf32>
    %c0_10 = arith.constant 0 : index
    %c0_11 = arith.constant 0 : index
    %40 = vector.load %arg5[%c0_10, %c0_11] : memref<1920x128xf32, #tpu.memory_space<vmem>>, vector<1920x128xf32>
    %cst_12 = arith.constant dense<0.000000e+00> : vector<16x128xf32>
    %41 = tpu.matmul %39, %40, %cst_12 {dimension_numbers = #tpu.dot_dimension_numbers<[1], [0], [0], [1], [0, 0, 1, 1], [], []>} : vector<16x1920xf32>, vector<1920x128xf32>, vector<16x128xf32> -> vector<16x128xf32>
    %42 = arith.addf %21, %41 : vector<16x128xf32>
    %c0_13 = arith.constant 0 : index
    %c0_14 = arith.constant 0 : index
    %c0_15 = arith.constant 0 : index
    %43 = vector.load %arg6[%c0_13, %c0_14, %c0_15] : memref<1x16x128xf32, #tpu.memory_space<vmem>>, vector<1x16x128xf32>
    %44 = vector.shape_cast %43 : vector<1x16x128xf32> to vector<16x128xf32>
    %45 = vector.shape_cast %42 : vector<16x128xf32> to vector<1x16x128xf32>
    tpu.vector_store %arg6[%c0_13, %c0_14, %c0_15], %45 {strides = array<i32>} : memref<1x16x128xf32, #tpu.memory_space<vmem>>, vector<1x16x128xf32>,
    return
  }
  func.func @transform_0(%arg0: i32) -> (i32, i32, i32) {
    %c0_i32 = arith.constant 0 : i32
    %c0_i32_0 = arith.constant 0 : i32
    %c0_i32_1 = arith.constant 0 : i32
    return %arg0, %c0_i32, %c0_i32_0 : i32, i32, i32
  }
  func.func @transform_1(%arg0: i32) -> (i32, i32) {
    %c0_i32 = arith.constant 0 : i32
    %c0_i32_0 = arith.constant 0 : i32
    %c0_i32_1 = arith.constant 0 : i32
    return %c0_i32, %c0_i32_0 : i32, i32
  }
  func.func @transform_2(%arg0: i32) -> (i32, i32) {
    %c0_i32 = arith.constant 0 : i32
    %c0_i32_0 = arith.constant 0 : i32
    %c0_i32_1 = arith.constant 0 : i32
    return %c0_i32, %c0_i32_0 : i32, i32
  }
  func.func @transform_3(%arg0: i32) -> (i32, i32) {
    %c0_i32 = arith.constant 0 : i32
    %c0_i32_0 = arith.constant 0 : i32
    %c0_i32_1 = arith.constant 0 : i32
    return %c0_i32, %c0_i32_0 : i32, i32
  }
  func.func @transform_4(%arg0: i32) -> (i32, i32) {
    %c0_i32 = arith.constant 0 : i32
    %c0_i32_0 = arith.constant 0 : i32
    %c0_i32_1 = arith.constant 0 : i32
    return %c0_i32, %c0_i32_0 : i32, i32
  }
  func.func @transform_5(%arg0: i32) -> (i32, i32, i32) {
    %c0_i32 = arith.constant 0 : i32
    %c0_i32_0 = arith.constant 0 : i32
    %c0_i32_1 = arith.constant 0 : i32
    return %arg0, %c0_i32, %c0_i32_0 : i32, i32, i32
  }
}

</mosaic_0001>

<bundles_post_ra>
// kernel: gcn_forward.1
= control target key start
LH: loop header
LB: loop body
LE: loop exit
PB: predicated region body
PF: predicated region fallthrough
CT: control target
= control target key end

     0   :  { %s1748_s18 = smov 0   ;;  %s3581_s0 = inlined_call_operand.vmem [shape: f32[2,32,128], index: 0, kind: input, shape index: {}]   ;;  %s3582_s1 = inlined_call_operand.vmem [shape: f32[1920,128], index: 1, kind: input, shape index: {}]   ;;  %s3583_s2 = inlined_call_operand.vmem [shape: f32[128,128], index: 2, kind: input, shape index: {}]   ;;  %s3584_s3 = inlined_call_operand.vmem [shape: f32[128,128], index: 3, kind: input, shape index: {}]   ;;  %s3585_s4 = inlined_call_operand.vmem [shape: f32[1920,128], index: 4, kind: input, shape index: {}]   ;;  %s3586_s5 = inlined_call_operand.vmem [shape: f32[2,16,128], index: 5, kind: output, shape index: {}]  }
   0x1 LB: > { %s1689_s19 = sadd.s32 4294967295, %s1716_s18   ;;  %p1693_p0 = scmp.ge.s32.totalorder %s1716_s18, 1  ;;  %s1716_s18 = sphi %s1748_s18, %s15_s18  }
   0x2   : > { %p187_p1 = scmp.lt.s32.totalorder %s1716_s18, 3 }
   0x4   : > { %p188_p2 = pnand %p1693_p0, %p187_p1 }
   0x5   : > { %p1956_p3 = scmp.lt.s32.totalorder (!%p188_p2), %s1689_s19, 1 }
   0x6   : > { %191 = sbr.rel (%p188_p2) target bundleno = 516 (0x204), region = 40 }
   0xb   : > { %v322_v0 = vld [vmem:[%s3582_s1 + $0x78] sm:$0xff]  ;;  %v321_v3 = vld [vmem:[%s3582_s1 + $0x70] sm:$0xff]  ;;  %v320_v7 = vld [vmem:[%s3582_s1 + $0x68] sm:$0xff]  ;;  %s3589_s19 = smov (!%p1956_p3, %s1689_s19), 1  ;;  %vm240_vm0 = vcmask 1045504   ;;  %vm248_vm1 = vcmask 1044480  }
   0xc   : > { %v354_v1 = vld [vmem:[%s3582_s1 + $0x178] sm:$0xff]  ;;  %547 = vmatpush.msra.mxu0 %v322_v0  ;;  %v353_v5 = vld [vmem:[%s3582_s1 + $0x170] sm:$0xff]  ;;  %v352_v9 = vld [vmem:[%s3582_s1 + $0x168] sm:$0xff]  ;;  %s1700_s24 = sshll.u32 %s3589_s19, 5  ;;  %vm232_vm2 = vcmask 1046528   ;;  %vm272_vm3 = vcmask 1041408  }
   0xd   : > { %v370_v2 = vld [vmem:[%s3582_s1 + $0x1f8] sm:$0xff]  ;;  %593 = vmatpush.msra.mxu2 %v354_v1  ;;  %v369_v6 = vld [vmem:[%s3582_s1 + $0x1f0] sm:$0xff]  ;;  %v368_v10 = vld [vmem:[%s3582_s1 + $0x1e8] sm:$0xff]  ;;  %s2036_s14 = scalar_lea.vmem %s3581_s0, %s1700_s24  ;;  %vm256_vm4 = vcmask 1043456   ;;  %vm280_vm5 = vcmask 1040384   ;;  %vm264_vm6 = vcmask 1042432  }
   0xe   : > { %v338_v4 = vld [vmem:[%s3582_s1 + $0xf8] sm:$0xff]  ;;  %616 = vmatpush.msra.mxu3 %v370_v2  ;;  %v337_v8 = vld [vmem:[%s3582_s1 + $0xf0] sm:$0xff]  ;;  %548 = vmatpush.msra.mxu0 %v321_v3  ;;  %v319_v11 = vld [vmem:[%s3582_s1 + $0x60] sm:$0xff]  ;;  %s1701_s23 = sshll.u32 %s3589_s19, 4 }
   0xf   : > { %570 = vmatpush.msra.mxu1 %v338_v4  ;;  %594 = vmatpush.msra.mxu2 %v353_v5  ;;  %v336_v12 = vld [vmem:[%s3582_s1 + $0xe8] sm:$0xff]  ;;  %v351_v13 = vld [vmem:[%s3582_s1 + $0x160] sm:$0xff]  ;;  %v318_v16 = vld [vmem:[%s3582_s1 + $0x58] sm:$0xff]  ;;  %s224_s26 = scalar_lea.vmem %s3586_s5, %s1701_s23 }
  0x10   : > { %617 = vmatpush.msra.mxu3 %v369_v6  ;;  %549 = vmatpush.msra.mxu0 %v320_v7  ;;  %v367_v14 = vld [vmem:[%s3582_s1 + $0x1e0] sm:$0xff]  ;;  %v350_v17 = vld [vmem:[%s3582_s1 + $0x158] sm:$0xff]  ;;  %v317_v20 = vld [vmem:[%s3582_s1 + $0x50] sm:$0xff] }
  0x11   : > { %571 = vmatpush.msra.mxu1 %v337_v8  ;;  %595 = vmatpush.msra.mxu2 %v352_v9  ;;  %v335_v15 = vld [vmem:[%s3582_s1 + $0xe0] sm:$0xff]  ;;  %v366_v18 = vld [vmem:[%s3582_s1 + $0x1d8] sm:$0xff]  ;;  %v349_v21 = vld [vmem:[%s3582_s1 + $0x150] sm:$0xff] }
  0x12   : > { %618 = vmatpush.msra.mxu3 %v368_v10  ;;  %550 = vmatpush.msra.mxu0 %v319_v11  ;;  %v334_v19 = vld [vmem:[%s3582_s1 + $0xd8] sm:$0xff]  ;;  %v365_v22 = vld [vmem:[%s3582_s1 + $0x1d0] sm:$0xff]  ;;  %v316_v24 = vld [vmem:[%s3582_s1 + $0x48] sm:$0xff] }
  0x13   : > { %572 = vmatpush.msra.mxu1 %v336_v12  ;;  %596 = vmatpush.msra.mxu2 %v351_v13  ;;  %v333_v23 = vld [vmem:[%s3582_s1 + $0xd0] sm:$0xff]  ;;  %v348_v25 = vld [vmem:[%s3582_s1 + $0x148] sm:$0xff]  ;;  %v315_v28 = vld [vmem:[%s3582_s1 + $0x40] sm:$0xff] }
  0x14   : > { %619 = vmatpush.msra.mxu3 %v367_v14  ;;  %551 = vmatpush.msra.mxu0 %v318_v16  ;;  %v364_v26 = vld [vmem:[%s3582_s1 + $0x1c8] sm:$0xff]  ;;  %v347_v29 = vld [vmem:[%s3582_s1 + $0x140] sm:$0xff]  ;;  %v314_v32 = vld [vmem:[%s3582_s1 + $0x38] sm:$0xff] }
  0x15   : > { %573 = vmatpush.msra.mxu1 %v335_v15  ;;  %597 = vmatpush.msra.mxu2 %v350_v17  ;;  %v332_v27 = vld [vmem:[%s3582_s1 + $0xc8] sm:$0xff]  ;;  %v363_v30 = vld [vmem:[%s3582_s1 + $0x1c0] sm:$0xff]  ;;  %v346_v33 = vld [vmem:[%s3582_s1 + $0x138] sm:$0xff] }
  0x16   : > { %620 = vmatpush.msra.mxu3 %v366_v18  ;;  %552 = vmatpush.msra.mxu0 %v317_v20  ;;  %v331_v31 = vld [vmem:[%s3582_s1 + $0xc0] sm:$0xff]  ;;  %v362_v34 = vld [vmem:[%s3582_s1 + $0x1b8] sm:$0xff]  ;;  %v313_v36 = vld [vmem:[%s3582_s1 + $0x30] sm:$0xff] }
  0x17   : > { %574 = vmatpush.msra.mxu1 %v334_v19  ;;  %598 = vmatpush.msra.mxu2 %v349_v21  ;;  %v330_v35 = vld [vmem:[%s3582_s1 + $0xb8] sm:$0xff]  ;;  %v345_v37 = vld [vmem:[%s3582_s1 + $0x130] sm:$0xff]  ;;  %v312_v40 = vld [vmem:[%s3582_s1 + $0x28] sm:$0xff] }
  0x18   : > { %621 = vmatpush.msra.mxu3 %v365_v22  ;;  %553 = vmatpush.msra.mxu0 %v316_v24  ;;  %v361_v38 = vld [vmem:[%s3582_s1 + $0x1b0] sm:$0xff]  ;;  %v344_v41 = vld [vmem:[%s3582_s1 + $0x128] sm:$0xff]  ;;  %v311_v44 = vld [vmem:[%s3582_s1 + $0x20] sm:$0xff] }
  0x19   : > { %575 = vmatpush.msra.mxu1 %v333_v23  ;;  %599 = vmatpush.msra.mxu2 %v348_v25  ;;  %v329_v39 = vld [vmem:[%s3582_s1 + $0xb0] sm:$0xff]  ;;  %v360_v42 = vld [vmem:[%s3582_s1 + $0x1a8] sm:$0xff]  ;;  %v343_v45 = vld [vmem:[%s3582_s1 + $0x120] sm:$0xff] }
  0x1a   : > { %622 = vmatpush.msra.mxu3 %v364_v26  ;;  %554 = vmatpush.msra.mxu0 %v315_v28  ;;  %v328_v43 = vld [vmem:[%s3582_s1 + $0xa8] sm:$0xff]  ;;  %v359_v46 = vld [vmem:[%s3582_s1 + $0x1a0] sm:$0xff]  ;;  %v310_v48 = vld [vmem:[%s3582_s1 + $0x18] sm:$0xff] }
  0x1b   : > { %576 = vmatpush.msra.mxu1 %v332_v27  ;;  %600 = vmatpush.msra.mxu2 %v347_v29  ;;  %v327_v47 = vld [vmem:[%s3582_s1 + $0xa0] sm:$0xff]  ;;  %v342_v49 = vld [vmem:[%s3582_s1 + $0x118] sm:$0xff]  ;;  %v309_v52 = vld [vmem:[%s3582_s1 + $0x10] sm:$0xff] }
  0x1c   : > { %623 = vmatpush.msra.mxu3 %v363_v30  ;;  %555 = vmatpush.msra.mxu0 %v314_v32  ;;  %v358_v50 = vld [vmem:[%s3582_s1 + $0x198] sm:$0xff]  ;;  %v341_v53 = vld [vmem:[%s3582_s1 + $0x110] sm:$0xff]  ;;  %v308_v56 = vld [vmem:[%s3582_s1 + $0x8] sm:$0xff] }
  0x1d   : > { %577 = vmatpush.msra.mxu1 %v331_v31  ;;  %601 = vmatpush.msra.mxu2 %v346_v33  ;;  %v326_v51 = vld [vmem:[%s3582_s1 + $0x98] sm:$0xff]  ;;  %v357_v54 = vld [vmem:[%s3582_s1 + $0x190] sm:$0xff]  ;;  %v340_v57 = vld [vmem:[%s3582_s1 + $0x108] sm:$0xff] }
  0x1e   : > { %624 = vmatpush.msra.mxu3 %v362_v34  ;;  %556 = vmatpush.msra.mxu0 %v313_v36  ;;  %v325_v55 = vld [vmem:[%s3582_s1 + $0x90] sm:$0xff]  ;;  %v356_v58 = vld [vmem:[%s3582_s1 + $0x188] sm:$0xff]  ;;  %v307_v60 = vld [vmem:[%s3582_s1] sm:$0xff] }
  0x1f   : > { %578 = vmatpush.msra.mxu1 %v330_v35  ;;  %602 = vmatpush.msra.mxu2 %v345_v37  ;;  %v324_v59 = vld [vmem:[%s3582_s1 + $0x88] sm:$0xff]  ;;  %v339_v61 = vld [vmem:[%s3582_s1 + $0x100] sm:$0xff]  ;;  %v386_v63 = vld [vmem:[%s3582_s1 + $0x278] sm:$0xff] }
  0x20   : > { %625 = vmatpush.msra.mxu3 %v361_v38  ;;  %557 = vmatpush.msra.mxu0 %v312_v40  ;;  %v355_v62 = vld [vmem:[%s3582_s1 + $0x180] sm:$0xff]  ;;  %v418_v0 = vld [vmem:[%s3582_s1 + $0x378] sm:$0xff]  ;;  %v385_v3 = vld [vmem:[%s3582_s1 + $0x270] sm:$0xff] }
  0x21   : > { %579 = vmatpush.msra.mxu1 %v329_v39  ;;  %603 = vmatpush.msra.mxu2 %v344_v41  ;;  %v434_v1 = vld [vmem:[%s3582_s1 + $0x3f8] sm:$0xff]  ;;  %v323_v2 = vld [vmem:[%s3582_s1 + $0x80] sm:$0xff]  ;;  %v417_v5 = vld [vmem:[%s3582_s1 + $0x370] sm:$0xff] }
  0x22   : > { %626 = vmatpush.msra.mxu3 %v360_v42  ;;  %558 = vmatpush.msra.mxu0 %v311_v44  ;;  %v402_v4 = vld [vmem:[%s3582_s1 + $0x2f8] sm:$0xff]  ;;  %v433_v6 = vld [vmem:[%s3582_s1 + $0x3f0] sm:$0xff]  ;;  %v384_v7 = vld [vmem:[%s3582_s1 + $0x268] sm:$0xff] }
  0x23   : > { %580 = vmatpush.msra.mxu1 %v328_v43  ;;  %604 = vmatpush.msra.mxu2 %v343_v45  ;;  %v401_v8 = vld [vmem:[%s3582_s1 + $0x2f0] sm:$0xff]  ;;  %v416_v9 = vld [vmem:[%s3582_s1 + $0x368] sm:$0xff]  ;;  %v383_v11 = vld [vmem:[%s3582_s1 + $0x260] sm:$0xff] }
  0x24   : > { %627 = vmatpush.msra.mxu3 %v359_v46  ;;  %559 = vmatpush.msra.mxu0 %v310_v48  ;;  %v432_v10 = vld [vmem:[%s3582_s1 + $0x3e8] sm:$0xff]  ;;  %v415_v13 = vld [vmem:[%s3582_s1 + $0x360] sm:$0xff]  ;;  %v382_v15 = vld [vmem:[%s3582_s1 + $0x258] sm:$0xff] }
  0x25   : > { %581 = vmatpush.msra.mxu1 %v327_v47  ;;  %605 = vmatpush.msra.mxu2 %v342_v49  ;;  %v400_v12 = vld [vmem:[%s3582_s1 + $0x2e8] sm:$0xff]  ;;  %v431_v14 = vld [vmem:[%s3582_s1 + $0x3e0] sm:$0xff]  ;;  %v414_v17 = vld [vmem:[%s3582_s1 + $0x358] sm:$0xff] }
  0x26   : > { %628 = vmatpush.msra.mxu3 %v358_v50  ;;  %560 = vmatpush.msra.mxu0 %v309_v52  ;;  %v399_v16 = vld [vmem:[%s3582_s1 + $0x2e0] sm:$0xff]  ;;  %v430_v18 = vld [vmem:[%s3582_s1 + $0x3d8] sm:$0xff]  ;;  %v381_v19 = vld [vmem:[%s3582_s1 + $0x250] sm:$0xff] }
  0x27   : > { %582 = vmatpush.msra.mxu1 %v326_v51  ;;  %606 = vmatpush.msra.mxu2 %v341_v53  ;;  %v398_v20 = vld [vmem:[%s3582_s1 + $0x2d8] sm:$0xff]  ;;  %v413_v21 = vld [vmem:[%s3582_s1 + $0x350] sm:$0xff]  ;;  %v380_v23 = vld [vmem:[%s3582_s1 + $0x248] sm:$0xff] }
  0x28   : > { %629 = vmatpush.msra.mxu3 %v357_v54  ;;  %561 = vmatpush.msra.mxu0 %v308_v56  ;;  %v429_v22 = vld [vmem:[%s3582_s1 + $0x3d0] sm:$0xff]  ;;  %v412_v25 = vld [vmem:[%s3582_s1 + $0x348] sm:$0xff]  ;;  %v379_v27 = vld [vmem:[%s3582_s1 + $0x240] sm:$0xff] }
  0x29   : > { %583 = vmatpush.msra.mxu1 %v325_v55  ;;  %607 = vmatpush.msra.mxu2 %v340_v57  ;;  %v397_v24 = vld [vmem:[%s3582_s1 + $0x2d0] sm:$0xff]  ;;  %v428_v26 = vld [vmem:[%s3582_s1 + $0x3c8] sm:$0xff]  ;;  %v411_v29 = vld [vmem:[%s3582_s1 + $0x340] sm:$0xff] }
  0x2a   : > { %630 = vmatpush.msra.mxu3 %v356_v58  ;;  %562 = vmatpush.msra.mxu0 %v307_v60  ;;  %v396_v28 = vld [vmem:[%s3582_s1 + $0x2c8] sm:$0xff]  ;;  %v2057_v30 = vld [vmem:[%s2036_s14] sm:$0xff]  ;;  %v378_v33 = vld [vmem:[%s3582_s1 + $0x238] sm:$0xff] }
  0x2b   : > { %584 = vmatpush.msra.mxu1 %v324_v59  ;;  %608 = vmatpush.msra.mxu2 %v339_v61  ;;  %v2060_v31 = vld [vmem:[%s2036_s14 + $0x8] sm:$0xff]  ;;  %v427_v32 = vld [vmem:[%s3582_s1 + $0x3c0] sm:$0xff]  ;;  %v410_v35 = vld [vmem:[%s3582_s1 + $0x338] sm:$0xff]  ;;  %v241_v38 = vrot.slane %v2057_v30, 2  ;;  %v249_v46 = vrot.slane %v2057_v30, 3  ;;  %v233_v54 = vrot.slane %v2057_v30, 1 }
  0x2c   : > { %631 = vmatpush.msra.mxu3 %v355_v62  ;;  %639 = vmatpush.msrb.mxu0 %v386_v63  ;;  %v395_v34 = vld [vmem:[%s3582_s1 + $0x2c0] sm:$0xff]  ;;  %v426_v36 = vld [vmem:[%s3582_s1 + $0x3b8] sm:$0xff]  ;;  %v377_v37 = vld [vmem:[%s3582_s1 + $0x230] sm:$0xff]  ;;  %v242_v39 = vrot.slane %v2060_v31, 2  ;;  %v250_v47 = vrot.slane %v2060_v31, 3  ;;  %v234_v55 = vrot.slane %v2060_v31, 1 }
  0x2d   : > { %685 = vmatpush.msrb.mxu2 %v418_v0  ;;  %585 = vmatpush.msra.mxu1 %v323_v2  ;;  %v394_v40 = vld [vmem:[%s3582_s1 + $0x2b8] sm:$0xff]  ;;  %v409_v41 = vld [vmem:[%s3582_s1 + $0x330] sm:$0xff]  ;;  %v376_v43 = vld [vmem:[%s3582_s1 + $0x228] sm:$0xff] }
  0x2e   : > { %708 = vmatpush.msrb.mxu3 %v434_v1  ;;  %640 = vmatpush.msrb.mxu0 %v385_v3  ;;  %v425_v42 = vld [vmem:[%s3582_s1 + $0x3b0] sm:$0xff]  ;;  %v408_v45 = vld [vmem:[%s3582_s1 + $0x328] sm:$0xff]  ;;  %v243_v49 = vsel %vm240_vm0, %v241_v38, %v242_v39  ;;  %v375_v50 = vld [vmem:[%s3582_s1 + $0x220] sm:$0xff]  ;;  %v251_v56 = vsel %vm248_vm1, %v249_v46, %v250_v47  ;;  %v235_v62 = vsel %vm232_vm2, %v233_v54, %v234_v55 }
  0x2f   : > { %662 = vmatpush.msrb.mxu1 %v402_v4  ;;  %686 = vmatpush.msrb.mxu2 %v417_v5  ;;  %v393_v44 = vld [vmem:[%s3582_s1 + $0x2b0] sm:$0xff]  ;;  %v424_v48 = vld [vmem:[%s3582_s1 + $0x3a8] sm:$0xff]  ;;  %v407_v52 = vld [vmem:[%s3582_s1 + $0x320] sm:$0xff] }
  0x30   : > { %709 = vmatpush.msrb.mxu3 %v433_v6  ;;  %641 = vmatpush.msrb.mxu0 %v384_v7  ;;  %v392_v51 = vld [vmem:[%s3582_s1 + $0x2a8] sm:$0xff]  ;;  %v423_v53 = vld [vmem:[%s3582_s1 + $0x3a0] sm:$0xff]  ;;  %v2126_v57 = vld [vmem:[%s2036_s14 + $0x10] sm:$0xff] }
  0x31   : > { %663 = vmatpush.msrb.mxu1 %v401_v8  ;;  %687 = vmatpush.msrb.mxu2 %v416_v9  ;;  %v374_v58 = vld [vmem:[%s3582_s1 + $0x218] sm:$0xff]  ;;  %v391_v59 = vld [vmem:[%s3582_s1 + $0x2a0] sm:$0xff]  ;;  %v373_v63 = vld [vmem:[%s3582_s1 + $0x210] sm:$0xff]  ;;  %v244_v0 = vrot.slane %v2126_v57, 2  ;;  %v252_v7 = vrot.slane %v2126_v57, 3 }
  0x32   : > { %710 = vmatpush.msrb.mxu3 %v432_v10  ;;  %642 = vmatpush.msrb.mxu0 %v383_v11  ;;  %v406_v60 = vld [vmem:[%s3582_s1 + $0x318] sm:$0xff]  ;;  %v405_v2 = vld [vmem:[%s3582_s1 + $0x310] sm:$0xff]  ;;  %v372_v4 = vld [vmem:[%s3582_s1 + $0x208] sm:$0xff] }
  0x33   : > { %664 = vmatpush.msrb.mxu1 %v400_v12  ;;  %688 = vmatpush.msrb.mxu2 %v415_v13  ;;  %v422_v61 = vld [vmem:[%s3582_s1 + $0x398] sm:$0xff]  ;;  %v421_v3 = vld [vmem:[%s3582_s1 + $0x390] sm:$0xff]  ;;  %v404_v6 = vld [vmem:[%s3582_s1 + $0x308] sm:$0xff]  ;;  %v2173_v9 = vsel %vm240_vm0, %v242_v39, %v244_v0 }
  0x34   : > { %711 = vmatpush.msrb.mxu3 %v431_v14  ;;  %643 = vmatpush.msrb.mxu0 %v382_v15  ;;  %v390_v1 = vld [vmem:[%s3582_s1 + $0x298] sm:$0xff]  ;;  %v389_v5 = vld [vmem:[%s3582_s1 + $0x290] sm:$0xff]  ;;  %v420_v8 = vld [vmem:[%s3582_s1 + $0x388] sm:$0xff]  ;;  %v236_v14 = vrot.slane %v2126_v57, 1  ;;  %v2194_v15 = vsel %vm248_vm1, %v250_v47, %v252_v7 }
  0x35   : > { %665 = vmatpush.msrb.mxu1 %v399_v16  ;;  %689 = vmatpush.msrb.mxu2 %v414_v17  ;;  %v371_v10 = vld [vmem:[%s3582_s1 + $0x200] sm:$0xff]  ;;  %v388_v11 = vld [vmem:[%s3582_s1 + $0x288] sm:$0xff]  ;;  %v450_v16 = vld [vmem:[%s3582_s1 + $0x478] sm:$0xff] }
  0x36   : > { %712 = vmatpush.msrb.mxu3 %v430_v18  ;;  %644 = vmatpush.msrb.mxu0 %v381_v19  ;;  %v403_v12 = vld [vmem:[%s3582_s1 + $0x300] sm:$0xff]  ;;  %v482_v17 = vld [vmem:[%s3582_s1 + $0x578] sm:$0xff]  ;;  %v464_v39 = vld [vmem:[%s3582_s1 + $0x4e8] sm:$0xff] }
  0x37   : > { %666 = vmatpush.msrb.mxu1 %v398_v20  ;;  %690 = vmatpush.msrb.mxu2 %v413_v21  ;;  %v419_v13 = vld [vmem:[%s3582_s1 + $0x380] sm:$0xff]  ;;  %v498_v18 = vld [vmem:[%s3582_s1 + $0x5f8] sm:$0xff]  ;;  %v2213_v20 = vsel %vm232_vm2, %v234_v55, %v236_v14  ;;  %v449_v21 = vld [vmem:[%s3582_s1 + $0x470] sm:$0xff] }
  0x38   : > { %713 = vmatpush.msrb.mxu3 %v429_v22  ;;  %645 = vmatpush.msrb.mxu0 %v380_v23  ;;  %v387_v19 = vld [vmem:[%s3582_s1 + $0x280] sm:$0xff]  ;;  %v273_v22 = vrot.slane %v2057_v30, 6  ;;  %v274_v23 = vrot.slane %v2060_v31, 6  ;;  %v446_v46 = vld [vmem:[%s3582_s1 + $0x458] sm:$0xff]  ;;  %v493_v54 = vld [vmem:[%s3582_s1 + $0x5d0] sm:$0xff] }
  0x39   : > { %667 = vmatpush.msrb.mxu1 %v397_v24  ;;  %691 = vmatpush.msrb.mxu2 %v412_v25  ;;  %v466_v24 = vld [vmem:[%s3582_s1 + $0x4f8] sm:$0xff]  ;;  %v481_v25 = vld [vmem:[%s3582_s1 + $0x570] sm:$0xff]  ;;  %v447_v38 = vld [vmem:[%s3582_s1 + $0x460] sm:$0xff] }
  0x3a   : > { %714 = vmatpush.msrb.mxu3 %v428_v26  ;;  %646 = vmatpush.msrb.mxu0 %v379_v27  ;;  %v497_v26 = vld [vmem:[%s3582_s1 + $0x5f0] sm:$0xff]  ;;  %v448_v27 = vld [vmem:[%s3582_s1 + $0x468] sm:$0xff]  ;;  %v463_v47 = vld [vmem:[%s3582_s1 + $0x4e0] sm:$0xff] }
  0x3b   : > { %668 = vmatpush.msrb.mxu1 %v396_v28  ;;  %692 = vmatpush.msrb.mxu2 %v411_v29  ;;  %v465_v28 = vld [vmem:[%s3582_s1 + $0x4f0] sm:$0xff]  ;;  %v480_v29 = vld [vmem:[%s3582_s1 + $0x568] sm:$0xff] }
  0x3c   : > { %715 = vmatpush.msrb.mxu3 %v427_v32  ;;  %647 = vmatpush.msrb.mxu0 %v378_v33  ;;  %v257_v32 = vrot.slane %v2057_v30, 4  ;;  %v258_v33 = vrot.slane %v2060_v31, 4  ;;  %v444_v55 = vld [vmem:[%s3582_s1 + $0x448] sm:$0xff] }
  0x3d   : > { %669 = vmatpush.msrb.mxu1 %v395_v34  ;;  %693 = vmatpush.msrb.mxu2 %v410_v35  ;;  %v281_v34 = vrot.slane %v2057_v30, 7  ;;  %v282_v35 = vrot.slane %v2060_v31, 7 }
  0x3e   : > { %716 = vmatpush.msrb.mxu3 %v426_v36  ;;  %648 = vmatpush.msrb.mxu0 %v377_v37  ;;  %v496_v36 = vld [vmem:[%s3582_s1 + $0x5e8] sm:$0xff]  ;;  %v275_v37 = vsel %vm272_vm3, %v273_v22, %v274_v23  ;;  %v471_v22 = vld [vmem:[%s3582_s1 + $0x520] sm:$0xff] }
  0x3f   : > { %670 = vmatpush.msrb.mxu1 %v394_v40  ;;  %694 = vmatpush.msrb.mxu2 %v409_v41  ;;  %v479_v40 = vld [vmem:[%s3582_s1 + $0x560] sm:$0xff] }
  0x40   : > { %717 = vmatpush.msrb.mxu3 %v425_v42  ;;  %649 = vmatpush.msrb.mxu0 %v376_v43  ;;  %v495_v41 = vld [vmem:[%s3582_s1 + $0x5e0] sm:$0xff]  ;;  %v265_v42 = vrot.slane %v2057_v30, 5  ;;  %v266_v43 = vrot.slane %v2060_v31, 5 }
  0x41   : > { %671 = vmatpush.msrb.mxu1 %v393_v44  ;;  %695 = vmatpush.msrb.mxu2 %v408_v45  ;;  %v259_v44 = vsel %vm256_vm4, %v257_v32, %v258_v33  ;;  %v283_v45 = vsel %vm280_vm5, %v281_v34, %v282_v35  ;;  %v455_v32 = vld [vmem:[%s3582_s1 + $0x4a0] sm:$0xff] }
  0x42   : > { %718 = vmatpush.msrb.mxu3 %v424_v48  ;;  %609 = vmatmul.f32.vlgmr.msra.gmra.mxu2 %v243_v49  ;;  %v478_v48 = vld [vmem:[%s3582_s1 + $0x558] sm:$0xff] }
  0x43   : > { %650 = vmatpush.msrb.mxu0 %v375_v50  ;;  %672 = vmatpush.msrb.mxu1 %v392_v51  ;;  %v494_v49 = vld [vmem:[%s3582_s1 + $0x5d8] sm:$0xff]  ;;  %v267_v50 = vsel %vm264_vm6, %v265_v42, %v266_v43  ;;  %v445_v51 = vld [vmem:[%s3582_s1 + $0x450] sm:$0xff]  ;;  %v468_v42 = vld [vmem:[%s3582_s1 + $0x508] sm:$0xff] }
  0x44   : > { %696 = vmatpush.msrb.mxu2 %v407_v52  ;;  %719 = vmatpush.msrb.mxu3 %v423_v53  ;;  %v462_v52 = vld [vmem:[%s3582_s1 + $0x4d8] sm:$0xff]  ;;  %v477_v53 = vld [vmem:[%s3582_s1 + $0x550] sm:$0xff] }
  0x45   : > { %563 = vmatmul.f32.vlgmr.msra.gmra.mxu0 %v2057_v30  ;;  %632 = vmatmul.f32.vlgmr.msra.gmra.mxu3 %v251_v56  ;;  %v461_v56 = vld [vmem:[%s3582_s1 + $0x4d0] sm:$0xff] }
  0x46   : > { %651 = vmatpush.msrb.mxu0 %v374_v58  ;;  %673 = vmatpush.msrb.mxu1 %v391_v59  ;;  %v476_v58 = vld [vmem:[%s3582_s1 + $0x548] sm:$0xff] }
  0x47   : > { %697 = vmatpush.msrb.mxu2 %v406_v60  ;;  %720 = vmatpush.msrb.mxu3 %v422_v61  ;;  %v492_v59 = vld [vmem:[%s3582_s1 + $0x5c8] sm:$0xff]  ;;  %v443_v60 = vld [vmem:[%s3582_s1 + $0x440] sm:$0xff] }
  0x48   : > { %586 = vmatmul.f32.vlgmr.msra.gmra.mxu1 %v235_v62  ;;  %652 = vmatpush.msrb.mxu0 %v373_v63  ;;  %v460_v61 = vld [vmem:[%s3582_s1 + $0x4c8] sm:$0xff]  ;;  %v475_v62 = vld [vmem:[%s3582_s1 + $0x540] sm:$0xff] }
  0x49   : > { %674 = vmatpush.msrb.mxu1 %v390_v1  ;;  %698 = vmatpush.msrb.mxu2 %v405_v2  ;;  %v491_v63 = vld [vmem:[%s3582_s1 + $0x5c0] sm:$0xff]  ;;  %v442_v1 = vld [vmem:[%s3582_s1 + $0x438] sm:$0xff] }
  0x4a   : > { %721 = vmatpush.msrb.mxu3 %v421_v3  ;;  %653 = vmatpush.msrb.mxu0 %v372_v4  ;;  %v459_v2 = vld [vmem:[%s3582_s1 + $0x4c0] sm:$0xff]  ;;  %v474_v3 = vld [vmem:[%s3582_s1 + $0x538] sm:$0xff] }
  0x4b   : > { %675 = vmatpush.msrb.mxu1 %v389_v5  ;;  %699 = vmatpush.msrb.mxu2 %v404_v6  ;;  %v490_v4 = vld [vmem:[%s3582_s1 + $0x5b8] sm:$0xff]  ;;  %v441_v5 = vld [vmem:[%s3582_s1 + $0x430] sm:$0xff] }
  0x4c   : > { %722 = vmatpush.msrb.mxu3 %v420_v8  ;;  %612 = vmatmul.f32.gmra.mxu2 %v2173_v9  ;;  %v458_v6 = vld [vmem:[%s3582_s1 + $0x4b8] sm:$0xff]  ;;  %v473_v8 = vld [vmem:[%s3582_s1 + $0x530] sm:$0xff] }
  0x4d   : > { %654 = vmatpush.msrb.mxu0 %v371_v10  ;;  %676 = vmatpush.msrb.mxu1 %v388_v11  ;;  %v489_v10 = vld [vmem:[%s3582_s1 + $0x5b0] sm:$0xff]  ;;  %v440_v11 = vld [vmem:[%s3582_s1 + $0x428] sm:$0xff] }
  0x4e   : > { %700 = vmatpush.msrb.mxu2 %v403_v12  ;;  %723 = vmatpush.msrb.mxu3 %v419_v13  ;;  %v260_v12 = vrot.slane %v2126_v57, 4  ;;  %v457_v13 = vld [vmem:[%s3582_s1 + $0x4b0] sm:$0xff] }
  0x4f   : > { %566 = vmatmul.f32.gmra.mxu0 %v2060_v31  ;;  %635 = vmatmul.f32.gmra.mxu3 %v2194_v15 }
  0x50   : > { %731 = vmatpush.msra.mxu0 %v450_v16  ;;  %777 = vmatpush.msra.mxu2 %v482_v17  ;;  %v472_v16 = vld [vmem:[%s3582_s1 + $0x528] sm:$0xff]  ;;  %v276_v17 = vrot.slane %v2126_v57, 6 }
  0x51   : > { %800 = vmatpush.msra.mxu3 %v498_v18  ;;  %677 = vmatpush.msrb.mxu1 %v387_v19  ;;  %v488_v18 = vld [vmem:[%s3582_s1 + $0x5a8] sm:$0xff]  ;;  %v439_v19 = vld [vmem:[%s3582_s1 + $0x420] sm:$0xff] }
  0x52   : > { %589 = vmatmul.f32.gmra.mxu1 %v2213_v20  ;;  %732 = vmatpush.msra.mxu0 %v449_v21  ;;  %v456_v21 = vld [vmem:[%s3582_s1 + $0x4a8] sm:$0xff] }
  0x53   : > { %754 = vmatpush.msra.mxu1 %v466_v24  ;;  %778 = vmatpush.msra.mxu2 %v481_v25  ;;  %v268_v24 = vrot.slane %v2126_v57, 5  ;;  %v487_v25 = vld [vmem:[%s3582_s1 + $0x5a0] sm:$0xff] }
  0x54   : > { %801 = vmatpush.msra.mxu3 %v497_v26  ;;  %733 = vmatpush.msra.mxu0 %v448_v27  ;;  %v2376_v26 = vsel %vm256_vm4, %v258_v33, %v260_v12  ;;  %v284_v27 = vrot.slane %v2126_v57, 7  ;;  %v470_v33 = vld [vmem:[%s3582_s1 + $0x518] sm:$0xff] }
  0x55   : > { %755 = vmatpush.msra.mxu1 %v465_v28  ;;  %779 = vmatpush.msra.mxu2 %v480_v29  ;;  %v2384_v28 = vsel %vm272_vm3, %v274_v23, %v276_v17  ;;  %v438_v29 = vld [vmem:[%s3582_s1 + $0x418] sm:$0xff]  ;;  %v2404_v34 = vsel %vm264_vm6, %v266_v43, %v268_v24  ;;  %v484_v43 = vld [vmem:[%s3582_s1 + $0x588] sm:$0xff] }
  0x56   : > { %802 = vmatpush.msra.mxu3 %v496_v36  ;;  %701 = vmatmul.f32.vlgmr.msrb.gmra.mxu2 %v275_v37  ;;  %v486_v23 = vld [vmem:[%s3582_s1 + $0x598] sm:$0xff]  ;;  %v285_v36 = vsel %vm280_vm5, %v282_v35, %v284_v27  ;;  %v437_v37 = vld [vmem:[%s3582_s1 + $0x410] sm:$0xff]  ;;  %v539_v27 = vld [vmem:[%s3582_s1 + $0x740] sm:$0xff] }
  0x57   : > { %734 = vmatpush.msra.mxu0 %v447_v38  ;;  %756 = vmatpush.msra.mxu1 %v464_v39  ;;  %v454_v38 = vld [vmem:[%s3582_s1 + $0x498] sm:$0xff]  ;;  %v469_v39 = vld [vmem:[%s3582_s1 + $0x510] sm:$0xff] }
  0x58   : > { %780 = vmatpush.msra.mxu2 %v479_v40  ;;  %803 = vmatpush.msra.mxu3 %v495_v41  ;;  %v485_v35 = vld [vmem:[%s3582_s1 + $0x590] sm:$0xff]  ;;  %v436_v40 = vld [vmem:[%s3582_s1 + $0x408] sm:$0xff] }
  0x59   : > { %655 = vmatmul.f32.vlgmr.msrb.gmra.mxu0 %v259_v44  ;;  %724 = vmatmul.f32.vlgmr.msrb.gmra.mxu3 %v283_v45  ;;  %v453_v41 = vld [vmem:[%s3582_s1 + $0x490] sm:$0xff]  ;;  %v435_v44 = vld [vmem:[%s3582_s1 + $0x400] sm:$0xff]  ;;  %v452_v45 = vld [vmem:[%s3582_s1 + $0x488] sm:$0xff] }
  0x5a   : > { %735 = vmatpush.msra.mxu0 %v446_v46  ;;  %757 = vmatpush.msra.mxu1 %v463_v47  ;;  %v467_v46 = vld [vmem:[%s3582_s1 + $0x500] sm:$0xff] }
  0x5b   : > { %781 = vmatpush.msra.mxu2 %v478_v48  ;;  %804 = vmatpush.msra.mxu3 %v494_v49  ;;  %v483_v47 = vld [vmem:[%s3582_s1 + $0x580] sm:$0xff]  ;;  %v514_v48 = vld [vmem:[%s3582_s1 + $0x678] sm:$0xff] }
  0x5c   : > { %678 = vmatmul.f32.vlgmr.msrb.gmra.mxu1 %v267_v50  ;;  %736 = vmatpush.msra.mxu0 %v445_v51  ;;  %v546_v49 = vld [vmem:[%s3582_s1 + $0x778] sm:$0xff]  ;;  %v451_v51 = vld [vmem:[%s3582_s1 + $0x480] sm:$0xff] }
  0x5d   : > { %758 = vmatpush.msra.mxu1 %v462_v52  ;;  %782 = vmatpush.msra.mxu2 %v477_v53  ;;  %v923_v50 = vld [vmem:[%s3584_s3 + $0x78] sm:$0xff]  ;;  %v513_v52 = vld [vmem:[%s3582_s1 + $0x670] sm:$0xff] }
  0x5e   : > { %805 = vmatpush.msra.mxu3 %v493_v54  ;;  %737 = vmatpush.msra.mxu0 %v444_v55  ;;  %v2465_v53 = vld [vmem:[%s2036_s14 + $0x18] sm:$0xff]  ;;  %v545_v55 = vld [vmem:[%s3582_s1 + $0x770] sm:$0xff] }
  0x5f   : > { %759 = vmatpush.msra.mxu1 %v461_v56  ;;  %783 = vmatpush.msra.mxu2 %v476_v58  ;;  %v530_v54 = vld [vmem:[%s3582_s1 + $0x6f8] sm:$0xff]  ;;  %v512_v56 = vld [vmem:[%s3582_s1 + $0x668] sm:$0xff]  ;;  %v529_v58 = vld [vmem:[%s3582_s1 + $0x6f0] sm:$0xff] }
  0x60   : > { %806 = vmatpush.msra.mxu3 %v492_v59  ;;  %738 = vmatpush.msra.mxu0 %v443_v60  ;;  %v544_v59 = vld [vmem:[%s3582_s1 + $0x768] sm:$0xff] }
  0x61   : > { %760 = vmatpush.msra.mxu1 %v460_v61  ;;  %784 = vmatpush.msra.mxu2 %v475_v62  ;;  %v921_v60 = vld [vmem:[%s3584_s3 + $0x68] sm:$0xff]  ;;  %v543_v62 = vld [vmem:[%s3582_s1 + $0x760] sm:$0xff] }
  0x62   : > { %807 = vmatpush.msra.mxu3 %v491_v63  ;;  %739 = vmatpush.msra.mxu0 %v442_v1  ;;  %v528_v61 = vld [vmem:[%s3582_s1 + $0x6e8] sm:$0xff]  ;;  %v289_v63 = vrot.slane %v2465_v53, 1  ;;  %v920_v1 = vld [vmem:[%s3584_s3 + $0x60] sm:$0xff] }
  0x63   : > { %761 = vmatpush.msra.mxu1 %v459_v2  ;;  %785 = vmatpush.msra.mxu2 %v474_v3  ;;  %v295_v2 = vrot.slane %v2465_v53, 3 }
  0x64   : > { %808 = vmatpush.msra.mxu3 %v490_v4  ;;  %740 = vmatpush.msra.mxu0 %v441_v5  ;;  %v510_v4 = vld [vmem:[%s3582_s1 + $0x658] sm:$0xff]  ;;  %v527_v5 = vld [vmem:[%s3582_s1 + $0x6e0] sm:$0xff] }
  0x65   : > { %762 = vmatpush.msra.mxu1 %v458_v6  ;;  %786 = vmatpush.msra.mxu2 %v473_v8  ;;  %v542_v6 = vld [vmem:[%s3582_s1 + $0x758] sm:$0xff]  ;;  %v290_v8 = vsel %vm232_vm2, %v236_v14, %v289_v63  ;;  %v541_v14 = vld [vmem:[%s3582_s1 + $0x750] sm:$0xff]  ;;  %v515_v63 = vld [vmem:[%s3582_s1 + $0x680] sm:$0xff] }
  0x66   : > { %809 = vmatpush.msra.mxu3 %v489_v10  ;;  %741 = vmatpush.msra.mxu0 %v440_v11  ;;  %v296_v10 = vsel %vm248_vm1, %v252_v7, %v295_v2  ;;  %v509_v11 = vld [vmem:[%s3582_s1 + $0x650] sm:$0xff]  ;;  %v304_v2 = vrot.slane %v2465_v53, 6 }
  0x67   : > { %763 = vmatpush.msra.mxu1 %v457_v13  ;;  %787 = vmatpush.msra.mxu2 %v472_v16  ;;  %v526_v13 = vld [vmem:[%s3582_s1 + $0x6d8] sm:$0xff]  ;;  %v918_v7 = vld [vmem:[%s3584_s3 + $0x50] sm:$0xff]  ;;  %v508_v16 = vld [vmem:[%s3582_s1 + $0x648] sm:$0xff] }
  0x68   : > { %810 = vmatpush.msra.mxu3 %v488_v18  ;;  %742 = vmatpush.msra.mxu0 %v439_v19  ;;  %v525_v18 = vld [vmem:[%s3582_s1 + $0x6d0] sm:$0xff]  ;;  %v540_v19 = vld [vmem:[%s3582_s1 + $0x748] sm:$0xff] }
  0x69   : > { %764 = vmatpush.msra.mxu1 %v456_v21  ;;  %788 = vmatpush.msra.mxu2 %v471_v22  ;;  %v917_v21 = vld [vmem:[%s3584_s3 + $0x48] sm:$0xff]  ;;  %v507_v22 = vld [vmem:[%s3582_s1 + $0x640] sm:$0xff] }
  0x6a   : > { %811 = vmatpush.msra.mxu3 %v487_v25  ;;  %658 = vmatmul.f32.gmra.mxu0 %v2376_v26  ;;  %v524_v25 = vld [vmem:[%s3582_s1 + $0x6c8] sm:$0xff] }
  0x6b   : > { %704 = vmatmul.f32.gmra.mxu2 %v2384_v28  ;;  %743 = vmatpush.msra.mxu0 %v438_v29  ;;  %v916_v29 = vld [vmem:[%s3584_s3 + $0x40] sm:$0xff] }
  0x6c   : > { %765 = vmatpush.msra.mxu1 %v455_v32  ;;  %789 = vmatpush.msra.mxu2 %v470_v33  ;;  %v506_v32 = vld [vmem:[%s3582_s1 + $0x638] sm:$0xff]  ;;  %v523_v33 = vld [vmem:[%s3582_s1 + $0x6c0] sm:$0xff] }
  0x6d   : > { %812 = vmatpush.msra.mxu3 %v486_v23  ;;  %681 = vmatmul.f32.gmra.mxu1 %v2404_v34  ;;  %v538_v23 = vld [vmem:[%s3582_s1 + $0x738] sm:$0xff] }
  0x6e   : > { %727 = vmatmul.f32.gmra.mxu3 %v285_v36  ;;  %744 = vmatpush.msra.mxu0 %v437_v37  ;;  %v915_v36 = vld [vmem:[%s3584_s3 + $0x38] sm:$0xff]  ;;  %v505_v37 = vld [vmem:[%s3582_s1 + $0x630] sm:$0xff] }
  0x6f   : > { %766 = vmatpush.msra.mxu1 %v454_v38  ;;  %790 = vmatpush.msra.mxu2 %v469_v39  ;;  %v522_v38 = vld [vmem:[%s3582_s1 + $0x6b8] sm:$0xff]  ;;  %v537_v39 = vld [vmem:[%s3582_s1 + $0x730] sm:$0xff] }
  0x70   : > { %813 = vmatpush.msra.mxu3 %v485_v35  ;;  %745 = vmatpush.msra.mxu0 %v436_v40  ;;  %v914_v35 = vld [vmem:[%s3584_s3 + $0x30] sm:$0xff]  ;;  %v504_v40 = vld [vmem:[%s3582_s1 + $0x628] sm:$0xff] }
  0x71   : > { %767 = vmatpush.msra.mxu1 %v453_v41  ;;  %791 = vmatpush.msra.mxu2 %v468_v42  ;;  %v521_v41 = vld [vmem:[%s3582_s1 + $0x6b0] sm:$0xff]  ;;  %v536_v42 = vld [vmem:[%s3582_s1 + $0x728] sm:$0xff] }
  0x72   : > { %814 = vmatpush.msra.mxu3 %v484_v43  ;;  %746 = vmatpush.msra.mxu0 %v435_v44  ;;  %v913_v43 = vld [vmem:[%s3584_s3 + $0x28] sm:$0xff]  ;;  %v503_v44 = vld [vmem:[%s3582_s1 + $0x620] sm:$0xff] }
  0x73   : > { %768 = vmatpush.msra.mxu1 %v452_v45  ;;  %792 = vmatpush.msra.mxu2 %v467_v46  ;;  %v520_v45 = vld [vmem:[%s3582_s1 + $0x6a8] sm:$0xff]  ;;  %v535_v46 = vld [vmem:[%s3582_s1 + $0x720] sm:$0xff] }
  0x74   : > { %815 = vmatpush.msra.mxu3 %v483_v47  ;;  %747 = vmatmul.f32.vlgmr.msra.gmra.mxu0 %v2060_v31  ;;  %v912_v47 = vld [vmem:[%s3584_s3 + $0x20] sm:$0xff] }
  0x75   : > { %793 = vmatmul.f32.vlgmr.msra.gmra.mxu2 %v2173_v9  ;;  %823 = vmatpush.msrb.mxu0 %v514_v48  ;;  %v922_v9 = vld [vmem:[%s3584_s3 + $0x70] sm:$0xff]  ;;  %v502_v48 = vld [vmem:[%s3582_s1 + $0x618] sm:$0xff] }
  0x76   : > { %869 = vmatpush.msrb.mxu2 %v546_v49  ;;  %924 = vmatpush.msrb.mxu3 %v923_v50  ;;  %v519_v49 = vld [vmem:[%s3582_s1 + $0x6a0] sm:$0xff]  ;;  %v534_v50 = vld [vmem:[%s3582_s1 + $0x718] sm:$0xff] }
  0x77   : > { %769 = vmatpush.msra.mxu1 %v451_v51  ;;  %816 = vmatmul.f32.vlgmr.msra.gmra.mxu3 %v2194_v15  ;;  %v292_v15 = vrot.slane %v2465_v53, 2  ;;  %v911_v51 = vld [vmem:[%s3584_s3 + $0x18] sm:$0xff] }
  0x78   : > { %770 = vmatmul.f32.vlgmr.msra.gmra.mxu1 %v2213_v20  ;;  %824 = vmatpush.msrb.mxu0 %v513_v52  ;;  %v511_v20 = vld [vmem:[%s3582_s1 + $0x660] sm:$0xff]  ;;  %v501_v52 = vld [vmem:[%s3582_s1 + $0x610] sm:$0xff] }
  0x79   : > { %846 = vmatpush.msrb.mxu1 %v530_v54  ;;  %870 = vmatpush.msrb.mxu2 %v545_v55  ;;  %v293_v3 = vsel %vm240_vm0, %v244_v0, %v292_v15  ;;  %v919_v0 = vld [vmem:[%s3584_s3 + $0x58] sm:$0xff]  ;;  %v533_v55 = vld [vmem:[%s3582_s1 + $0x710] sm:$0xff]  ;;  %v909_v15 = vld [vmem:[%s3584_s3 + $0x8] sm:$0xff] }
  0x7a   : > { %925 = vmatpush.msrb.mxu3 %v922_v9  ;;  %825 = vmatpush.msrb.mxu0 %v512_v56  ;;  %v518_v54 = vld [vmem:[%s3582_s1 + $0x698] sm:$0xff]  ;;  %v910_v9 = vld [vmem:[%s3584_s3 + $0x10] sm:$0xff]  ;;  %v500_v56 = vld [vmem:[%s3582_s1 + $0x608] sm:$0xff] }
  0x7b   : > { %847 = vmatpush.msrb.mxu1 %v529_v58  ;;  %871 = vmatpush.msrb.mxu2 %v544_v59  ;;  %v517_v58 = vld [vmem:[%s3582_s1 + $0x690] sm:$0xff]  ;;  %v532_v59 = vld [vmem:[%s3582_s1 + $0x708] sm:$0xff] }
  0x7c   : > { %926 = vmatpush.msrb.mxu3 %v921_v60  ;;  %826 = vmatpush.msrb.mxu0 %v511_v20  ;;  %v499_v60 = vld [vmem:[%s3582_s1 + $0x600] sm:$0xff]  ;;  %v516_v20 = vld [vmem:[%s3582_s1 + $0x688] sm:$0xff] }
  0x7d   : > { %848 = vmatpush.msrb.mxu1 %v528_v61  ;;  %872 = vmatpush.msrb.mxu2 %v543_v62  ;;  %v531_v61 = vld [vmem:[%s3582_s1 + $0x700] sm:$0xff] }
  0x7e   : > { %927 = vmatpush.msrb.mxu3 %v920_v1  ;;  %750 = vmatmul.f32.gmra.mxu0 %v2126_v57  ;;  %v908_v62 = vld [vmem:[%s3584_s3] sm:$0xff]  ;;  %v298_v1 = vrot.slane %v2465_v53, 4 }
  0x7f   : > { %796 = vmatmul.f32.gmra.mxu2 %v293_v3  ;;  %827 = vmatpush.msrb.mxu0 %v510_v4  ;;  %v301_v3 = vrot.slane %v2465_v53, 5 }
  0x80   : > { %849 = vmatpush.msrb.mxu1 %v527_v5  ;;  %873 = vmatpush.msrb.mxu2 %v542_v6  ;;  %v299_v4 = vsel %vm256_vm4, %v260_v12, %v298_v1  ;;  %v1039_v12 = vld [vmem:[%s3585_s4 + $0x78] sm:$0xff]  ;;  %v1033_v6 = vld [vmem:[%s3585_s4 + $0x48] sm:$0xff] }
  0x81   : > { %928 = vmatpush.msrb.mxu3 %v919_v0  ;;  %773 = vmatmul.f32.gmra.mxu1 %v290_v8  ;;  %v1087_v5 = vld [vmem:[%s3585_s4 + $0x1f8] sm:$0xff]  ;;  %v1054_v0 = vld [vmem:[%s3585_s4 + $0xf0] sm:$0xff] }
  0x82   : > { %819 = vmatmul.f32.gmra.mxu3 %v296_v10  ;;  %828 = vmatpush.msrb.mxu0 %v509_v11  ;;  %v1070_v8 = vld [vmem:[%s3585_s4 + $0x170] sm:$0xff]  ;;  %v1053_v11 = vld [vmem:[%s3585_s4 + $0xe8] sm:$0xff] }
  0x83   : > { %850 = vmatpush.msrb.mxu1 %v526_v13  ;;  %874 = vmatpush.msrb.mxu2 %v541_v14  ;;  %v1086_v10 = vld [vmem:[%s3585_s4 + $0x1f0] sm:$0xff]  ;;  %v1069_v13 = vld [vmem:[%s3585_s4 + $0x168] sm:$0xff] }
  0x84   : > { %929 = vmatpush.msrb.mxu3 %v918_v7  ;;  %829 = vmatpush.msrb.mxu0 %v508_v16  ;;  %v1032_v7 = vld [vmem:[%s3585_s4 + $0x40] sm:$0xff]  ;;  %v1085_v16 = vld [vmem:[%s3585_s4 + $0x1e8] sm:$0xff] }
  0x85   : > { %851 = vmatpush.msrb.mxu1 %v525_v18  ;;  %875 = vmatpush.msrb.mxu2 %v540_v19 }
  0x86   : > { %930 = vmatpush.msrb.mxu3 %v917_v21  ;;  %830 = vmatpush.msrb.mxu0 %v507_v22  ;;  %v1031_v22 = vld [vmem:[%s3585_s4 + $0x38] sm:$0xff] }
  0x87   : > { %852 = vmatpush.msrb.mxu1 %v524_v25  ;;  %876 = vmatpush.msrb.mxu2 %v539_v27  ;;  %v1052_v25 = vld [vmem:[%s3585_s4 + $0xe0] sm:$0xff] }
  0x88   : > { %931 = vmatpush.msrb.mxu3 %v916_v29  ;;  %831 = vmatpush.msrb.mxu0 %v506_v32  ;;  %v1068_v27 = vld [vmem:[%s3585_s4 + $0x160] sm:$0xff] }
  0x89   : > { %853 = vmatpush.msrb.mxu1 %v523_v33  ;;  %877 = vmatpush.msrb.mxu2 %v538_v23  ;;  %v1084_v29 = vld [vmem:[%s3585_s4 + $0x1e0] sm:$0xff]  ;;  %v1030_v33 = vld [vmem:[%s3585_s4 + $0x30] sm:$0xff]  ;;  %v1051_v23 = vld [vmem:[%s3585_s4 + $0xd8] sm:$0xff] }
  0x8a   : > { %932 = vmatpush.msrb.mxu3 %v915_v36  ;;  %832 = vmatpush.msrb.mxu0 %v505_v37  ;;  %v1067_v36 = vld [vmem:[%s3585_s4 + $0x158] sm:$0xff] }
  0x8b   : > { %854 = vmatpush.msrb.mxu1 %v522_v38  ;;  %878 = vmatpush.msrb.mxu2 %v537_v39  ;;  %v1083_v38 = vld [vmem:[%s3585_s4 + $0x1d8] sm:$0xff]  ;;  %v1029_v39 = vld [vmem:[%s3585_s4 + $0x28] sm:$0xff] }
  0x8c   : > { %933 = vmatpush.msrb.mxu3 %v914_v35  ;;  %833 = vmatpush.msrb.mxu0 %v504_v40  ;;  %v1050_v35 = vld [vmem:[%s3585_s4 + $0xd0] sm:$0xff] }
  0x8d   : > { %855 = vmatpush.msrb.mxu1 %v521_v41  ;;  %879 = vmatpush.msrb.mxu2 %v536_v42  ;;  %v1066_v40 = vld [vmem:[%s3585_s4 + $0x150] sm:$0xff] }
  0x8e   : > { %934 = vmatpush.msrb.mxu3 %v913_v43  ;;  %834 = vmatpush.msrb.mxu0 %v503_v44  ;;  %v1082_v41 = vld [vmem:[%s3585_s4 + $0x1d0] sm:$0xff] }
  0x8f   : > { %856 = vmatpush.msrb.mxu1 %v520_v45  ;;  %880 = vmatpush.msrb.mxu2 %v535_v46  ;;  %v1028_v45 = vld [vmem:[%s3585_s4 + $0x20] sm:$0xff]  ;;  %v1049_v46 = vld [vmem:[%s3585_s4 + $0xc8] sm:$0xff] }
  0x90   : > { %935 = vmatpush.msrb.mxu3 %v912_v47  ;;  %835 = vmatpush.msrb.mxu0 %v502_v48  ;;  %v1065_v47 = vld [vmem:[%s3585_s4 + $0x148] sm:$0xff] }
  0x91   : > { %857 = vmatpush.msrb.mxu1 %v519_v49  ;;  %881 = vmatpush.msrb.mxu2 %v534_v50  ;;  %v1081_v48 = vld [vmem:[%s3585_s4 + $0x1c8] sm:$0xff]  ;;  %v1027_v50 = vld [vmem:[%s3585_s4 + $0x18] sm:$0xff] }
  0x92   : > { %936 = vmatpush.msrb.mxu3 %v911_v51  ;;  %836 = vmatpush.msrb.mxu0 %v501_v52  ;;  %v1048_v51 = vld [vmem:[%s3585_s4 + $0xc0] sm:$0xff] }
  0x93   : > { %858 = vmatpush.msrb.mxu1 %v518_v54  ;;  %882 = vmatpush.msrb.mxu2 %v533_v55  ;;  %v1064_v52 = vld [vmem:[%s3585_s4 + $0x140] sm:$0xff] }
  0x94   : > { %937 = vmatpush.msrb.mxu3 %v910_v9  ;;  %837 = vmatpush.msrb.mxu0 %v500_v56  ;;  %v1080_v55 = vld [vmem:[%s3585_s4 + $0x1c0] sm:$0xff]  ;;  %v1026_v56 = vld [vmem:[%s3585_s4 + $0x10] sm:$0xff] }
  0x95   : > { %859 = vmatpush.msrb.mxu1 %v517_v58  ;;  %883 = vmatpush.msrb.mxu2 %v532_v59  ;;  %v1047_v58 = vld [vmem:[%s3585_s4 + $0xb8] sm:$0xff] }
  0x96   : > { %938 = vmatpush.msrb.mxu3 %v909_v15  ;;  %838 = vmatpush.msrb.mxu0 %v499_v60  ;;  %v1063_v59 = vld [vmem:[%s3585_s4 + $0x138] sm:$0xff] }
  0x97   : > { %860 = vmatpush.msrb.mxu1 %v516_v20  ;;  %884 = vmatpush.msrb.mxu2 %v531_v61  ;;  %v1079_v60 = vld [vmem:[%s3585_s4 + $0x1b8] sm:$0xff]  ;;  %v1025_v20 = vld [vmem:[%s3585_s4 + $0x8] sm:$0xff]  ;;  %v1046_v61 = vld [vmem:[%s3585_s4 + $0xb0] sm:$0xff] }
  0x98   : > { %939 = vmatpush.msrb.mxu3 %v908_v62  ;;  %839 = vmatmul.f32.vlgmr.msrb.gmra.mxu0 %v2376_v26  ;;  %v305_v26 = vsel %vm272_vm3, %v276_v17, %v304_v2  ;;  %v1038_v17 = vld [vmem:[%s3585_s4 + $0x70] sm:$0xff] }
  0x99   : > { %885 = vmatmul.f32.vlgmr.msrb.gmra.mxu2 %v2384_v28  ;;  %940 = vmatmul.f32.vlgmr.msrb.gmra.mxu3 %v2057_v30  ;;  %v302_v30 = vsel %vm264_vm6, %v268_v24, %v301_v3  ;;  %v1037_v24 = vld [vmem:[%s3585_s4 + $0x68] sm:$0xff]  ;;  %v1034_v28 = vld [vmem:[%s3585_s4 + $0x50] sm:$0xff]  ;;  %v1024_v3 = vld [vmem:[%s3585_s4] sm:$0xff] }
  0x9a   : > { %861 = vmatpush.msrb.mxu1 %v515_v63  ;;  %1264 = vmatpush.msra.mxu0 %v1039_v12  ;;  %v1062_v62 = vld [vmem:[%s3585_s4 + $0x130] sm:$0xff]  ;;  %v1077_v12 = vld [vmem:[%s3585_s4 + $0x1a8] sm:$0xff] }
  0x9b   : > { %862 = vmatmul.f32.vlgmr.msrb.gmra.mxu1 %v2404_v34  ;;  %v1055_v34 = vld [vmem:[%s3585_s4 + $0xf8] sm:$0xff]  ;;  %1333 = vmatpush.msra.mxu3 %v1087_v5  ;;  %v1078_v63 = vld [vmem:[%s3585_s4 + $0x1b0] sm:$0xff] }
  0x9c   : > { %1265 = vmatpush.msra.mxu0 %v1038_v17  ;;  %1287 = vmatpush.msra.mxu1 %v1055_v34  ;;  %v1103_v17 = vld [vmem:[%s3585_s4 + $0x278] sm:$0xff]  ;;  %v1060_v34 = vld [vmem:[%s3585_s4 + $0x120] sm:$0xff]  ;;  %v1102_v5 = vld [vmem:[%s3585_s4 + $0x270] sm:$0xff] }
  0x9d   : > { %1334 = vmatpush.msra.mxu3 %v1086_v10  ;;  %v1075_v10 = vld [vmem:[%s3585_s4 + $0x198] sm:$0xff] }
  0x9e   : > { %1266 = vmatpush.msra.mxu0 %v1037_v24  ;;  %1288 = vmatpush.msra.mxu1 %v1054_v0  ;;  %v1043_v0 = vld [vmem:[%s3585_s4 + $0x98] sm:$0xff] }
  0x9f   : > { %1335 = vmatpush.msra.mxu3 %v1085_v16  ;;  %v1074_v16 = vld [vmem:[%s3585_s4 + $0x190] sm:$0xff] }
  0xa0   : > { %842 = vmatmul.f32.gmra.mxu0 %v299_v4  ;;  %1289 = vmatpush.msra.mxu1 %v1053_v11  ;;  %v1045_v4 = vld [vmem:[%s3585_s4 + $0xa8] sm:$0xff] }
  0xa1   : > { %888 = vmatmul.f32.gmra.mxu2 %v305_v26  ;;  %943 = vmatmul.f32.gmra.mxu3 %v2060_v31  ;;  %v1036_v31 = vld [vmem:[%s3585_s4 + $0x60] sm:$0xff]  ;;  %v1061_v26 = vld [vmem:[%s3585_s4 + $0x128] sm:$0xff] }
  0xa2   : > { %1267 = vmatpush.msra.mxu0 %v1036_v31  ;;  %1290 = vmatpush.msra.mxu1 %v1052_v25 }
  0xa3   : > { %865 = vmatmul.f32.gmra.mxu1 %v302_v30  ;;  %1336 = vmatpush.msra.mxu3 %v1084_v29  ;;  %v1040_v29 = vld [vmem:[%s3585_s4 + $0x80] sm:$0xff] }
  0xa4   : > { %1291 = vmatpush.msra.mxu1 %v1051_v23 }
  0xa5   : > { %1337 = vmatpush.msra.mxu3 %v1083_v38  ;;  %v1135_v38 = vld [vmem:[%s3585_s4 + $0x378] sm:$0xff] }
  0xa6   : > { %1292 = vmatpush.msra.mxu1 %v1050_v35  ;;  %v1151_v35 = vld [vmem:[%s3585_s4 + $0x3f8] sm:$0xff] }
  0xa7   : > { %1338 = vmatpush.msra.mxu3 %v1082_v41  ;;  %v1118_v41 = vld [vmem:[%s3585_s4 + $0x2f0] sm:$0xff] }
  0xa8   : > { %1293 = vmatpush.msra.mxu1 %v1049_v46  ;;  %v1117_v46 = vld [vmem:[%s3585_s4 + $0x2e8] sm:$0xff] }
  0xa9   : > { %946 = vmatmul.f32.gmra.mxu3 %v2126_v57  ;;  %v1035_v57 = vld [vmem:[%s3585_s4 + $0x58] sm:$0xff] }
  0xaa   : > { %1268 = vmatpush.msra.mxu0 %v1035_v57  ;;  %1339 = vmatpush.msra.mxu3 %v1081_v48 }
  0xab   : > { %1294 = vmatpush.msra.mxu1 %v1048_v51  ;;  %v1116_v51 = vld [vmem:[%s3585_s4 + $0x2e0] sm:$0xff] }
  0xac   : > { %1269 = vmatpush.msra.mxu0 %v1034_v28  ;;  %1340 = vmatpush.msra.mxu3 %v1080_v55  ;;  %v1044_v28 = vld [vmem:[%s3585_s4 + $0xa0] sm:$0xff]  ;;  %v1094_v55 = vld [vmem:[%s3585_s4 + $0x230] sm:$0xff] }
  0xad   : > { %1295 = vmatpush.msra.mxu1 %v1047_v58  ;;  %v1131_v58 = vld [vmem:[%s3585_s4 + $0x358] sm:$0xff] }
  0xae   : > { %1270 = vmatpush.msra.mxu0 %v1033_v6  ;;  %1341 = vmatpush.msra.mxu3 %v1079_v60  ;;  %v1093_v60 = vld [vmem:[%s3585_s4 + $0x228] sm:$0xff] }
  0xaf   : > { %1296 = vmatpush.msra.mxu1 %v1046_v61  ;;  %v1130_v61 = vld [vmem:[%s3585_s4 + $0x350] sm:$0xff] }
  0xb0   : > { %1271 = vmatpush.msra.mxu0 %v1032_v7  ;;  %1342 = vmatpush.msra.mxu3 %v1078_v63  ;;  %v1058_v7 = vld [vmem:[%s3585_s4 + $0x110] sm:$0xff] }
  0xb1   : > { %949 = vmatmul.f32.gmra.mxu3 %v2465_v53  ;;  %v1071_v53 = vld [vmem:[%s3585_s4 + $0x178] sm:$0xff]  ;;  %1297 = vmatpush.msra.mxu1 %v1045_v4  ;;  %v1113_v4 = vld [vmem:[%s3585_s4 + $0x2c8] sm:$0xff] }
  0xb2   : > { %1310 = vmatpush.msra.mxu2 %v1071_v53  ;;  %1272 = vmatpush.msra.mxu0 %v1031_v22  ;;  %v1076_v53 = vld [vmem:[%s3585_s4 + $0x1a0] sm:$0xff]  ;;  %v1073_v22 = vld [vmem:[%s3585_s4 + $0x188] sm:$0xff] }
  0xb3   : > { %1343 = vmatpush.msra.mxu3 %v1077_v12  ;;  %1298 = vmatpush.msra.mxu1 %v1044_v28  ;;  %v1145_v12 = vld [vmem:[%s3585_s4 + $0x3c8] sm:$0xff]  ;;  %v1144_v28 = vld [vmem:[%s3585_s4 + $0x3c0] sm:$0xff] }
  0xb4   : > { %1311 = vmatpush.msra.mxu2 %v1070_v8  ;;  %1273 = vmatpush.msra.mxu0 %v1030_v33  ;;  %v1059_v8 = vld [vmem:[%s3585_s4 + $0x118] sm:$0xff]  ;;  %v1072_v33 = vld [vmem:[%s3585_s4 + $0x180] sm:$0xff] }
  0xb5   : > { %1344 = vmatpush.msra.mxu3 %v1076_v53  ;;  %1299 = vmatpush.msra.mxu1 %v1043_v0  ;;  %v1090_v53 = vld [vmem:[%s3585_s4 + $0x210] sm:$0xff]  ;;  %v1127_v0 = vld [vmem:[%s3585_s4 + $0x338] sm:$0xff] }
  0xb6   : > { %1312 = vmatpush.msra.mxu2 %v1069_v13  ;;  %1274 = vmatpush.msra.mxu0 %v1029_v39  ;;  %v1101_v13 = vld [vmem:[%s3585_s4 + $0x268] sm:$0xff] }
  0xb7   : > { %1345 = vmatpush.msra.mxu3 %v1075_v10 }
  0xb8   : > { %1313 = vmatpush.msra.mxu2 %v1068_v27  ;;  %1275 = vmatpush.msra.mxu0 %v1028_v45  ;;  %v1099_v27 = vld [vmem:[%s3585_s4 + $0x258] sm:$0xff] }
  0xb9   : > { %1346 = vmatpush.msra.mxu3 %v1074_v16  ;;  %v1142_v16 = vld [vmem:[%s3585_s4 + $0x3b0] sm:$0xff] }
  0xba   : > { %1314 = vmatpush.msra.mxu2 %v1067_v36  ;;  %1276 = vmatpush.msra.mxu0 %v1027_v50  ;;  %v1098_v36 = vld [vmem:[%s3585_s4 + $0x250] sm:$0xff]  ;;  %v1095_v50 = vld [vmem:[%s3585_s4 + $0x238] sm:$0xff] }
  0xbb   : > { %1347 = vmatpush.msra.mxu3 %v1073_v22  ;;  %v1109_v22 = vld [vmem:[%s3585_s4 + $0x2a8] sm:$0xff] }
  0xbc   : > { %1315 = vmatpush.msra.mxu2 %v1066_v40  ;;  %1277 = vmatpush.msra.mxu0 %v1026_v56  ;;  %v1097_v40 = vld [vmem:[%s3585_s4 + $0x248] sm:$0xff]  ;;  %v1115_v56 = vld [vmem:[%s3585_s4 + $0x2d8] sm:$0xff] }
  0xbd   : > { %1348 = vmatpush.msra.mxu3 %v1072_v33  ;;  %v1108_v33 = vld [vmem:[%s3585_s4 + $0x2a0] sm:$0xff] }
  0xbe   : > { %1316 = vmatpush.msra.mxu2 %v1065_v47  ;;  %1278 = vmatpush.msra.mxu0 %v1025_v20  ;;  %v1133_v47 = vld [vmem:[%s3585_s4 + $0x368] sm:$0xff]  ;;  %v1114_v20 = vld [vmem:[%s3585_s4 + $0x2d0] sm:$0xff] }
  0xbf   : > { %1425 = vmatpush.msrb.mxu3 %v1151_v35  ;;  %v1139_v35 = vld [vmem:[%s3585_s4 + $0x398] sm:$0xff] }
  0xc0   : > { %1317 = vmatpush.msra.mxu2 %v1064_v52  ;;  %1279 = vmatpush.msra.mxu0 %v1024_v3  ;;  %v1132_v52 = vld [vmem:[%s3585_s4 + $0x360] sm:$0xff] }
  0xc2   : > { %v564_v14 = vpop.f32.mrf.mxu0  ;;  %1318 = vmatpush.msra.mxu2 %v1063_v59  ;;  %1356 = vmatpush.msrb.mxu0 %v1103_v17 }
  0xc4   : > { %1319 = vmatpush.msra.mxu2 %v1062_v62  ;;  %1357 = vmatpush.msrb.mxu0 %v1102_v5 }
  0xc5   : > { %v587_v18 = vpop.f32.mrf.mxu1  ;;  %v610_v19 = vpop.f32.mrf.mxu2 }
  0xc6   : > { %v588_v32 = vadd.f32 %v587_v18, %v564_v14  ;;  %1320 = vmatpush.msra.mxu2 %v1061_v26  ;;  %v1042_v14 = vld [vmem:[%s3585_s4 + $0x90] sm:$0xff]  ;;  %1358 = vmatpush.msrb.mxu0 %v1101_v13  ;;  %v1100_v18 = vld [vmem:[%s3585_s4 + $0x260] sm:$0xff]  ;;  %v1129_v26 = vld [vmem:[%s3585_s4 + $0x348] sm:$0xff] }
  0xc7   : > { %1300 = vmatpush.msra.mxu1 %v1042_v14  ;;  %v1110_v13 = vld [vmem:[%s3585_s4 + $0x2b0] sm:$0xff] }
  0xc8   : > { %v633_v21 = vpop.f32.mrf.mxu3  ;;  %v611_v42 = vadd.f32 %v610_v19, %v588_v32  ;;  %1321 = vmatpush.msra.mxu2 %v1060_v34  ;;  %1359 = vmatpush.msrb.mxu0 %v1100_v18  ;;  %v1041_v19 = vld [vmem:[%s3585_s4 + $0x88] sm:$0xff]  ;;  %v1056_v32 = vld [vmem:[%s3585_s4 + $0x100] sm:$0xff]  ;;  %v1126_v14 = vld [vmem:[%s3585_s4 + $0x330] sm:$0xff] }
  0xc9   : > { %1301 = vmatpush.msra.mxu1 %v1041_v19 }
  0xca   : > { %v634_v54 = vadd.f32 %v633_v21, %v611_v42  ;;  %1322 = vmatpush.msra.mxu2 %v1059_v8  ;;  %v1057_v21 = vld [vmem:[%s3585_s4 + $0x108] sm:$0xff]  ;;  %1360 = vmatpush.msrb.mxu0 %v1099_v27  ;;  %v1134_v42 = vld [vmem:[%s3585_s4 + $0x370] sm:$0xff]  ;;  %v1143_v8 = vld [vmem:[%s3585_s4 + $0x3b8] sm:$0xff] }
  0xcb   : > { %1302 = vmatpush.msra.mxu1 %v1040_v29  ;;  %v1141_v27 = vld [vmem:[%s3585_s4 + $0x3a8] sm:$0xff] }
  0xcc   : > { %v2753_v37 = vpop.f32.mrf.mxu0  ;;  %1323 = vmatpush.msra.mxu2 %v1058_v7  ;;  %1361 = vmatpush.msrb.mxu0 %v1098_v36  ;;  %v1140_v36 = vld [vmem:[%s3585_s4 + $0x3a0] sm:$0xff] }
  0xce   : > { %1324 = vmatpush.msra.mxu2 %v1057_v21  ;;  %1362 = vmatpush.msrb.mxu0 %v1097_v40  ;;  %v1088_v21 = vld [vmem:[%s3585_s4 + $0x200] sm:$0xff] }
  0xcf   : > { %v590_v43 = vpop.f32.mrf.mxu1  ;;  %v2770_v44 = vpop.f32.mrf.mxu2 }
  0xd0   : > { %v591_v24 = vadd.f32 %v590_v43, %v2753_v37  ;;  %1325 = vmatpush.msra.mxu2 %v1056_v32  ;;  %v1119_v37 = vld [vmem:[%s3585_s4 + $0x2f8] sm:$0xff]  ;;  %v1150_v43 = vld [vmem:[%s3585_s4 + $0x3f0] sm:$0xff] }
  0xd1   : > { %1379 = vmatpush.msrb.mxu1 %v1119_v37  ;;  %1426 = vmatpush.msrb.mxu3 %v1150_v43 }
  0xd2   : > { %v2784_v49 = vpop.f32.mrf.mxu3  ;;  %v614_v11 = vadd.f32 %v2770_v44, %v591_v24  ;;  %1402 = vmatpush.msrb.mxu2 %v1135_v38  ;;  %v1096_v44 = vld [vmem:[%s3585_s4 + $0x240] sm:$0xff]  ;;  %v1091_v24 = vld [vmem:[%s3585_s4 + $0x218] sm:$0xff] }
  0xd3   : > { %1380 = vmatpush.msrb.mxu1 %v1118_v41  ;;  %1363 = vmatpush.msrb.mxu0 %v1096_v44  ;;  %v1107_v38 = vld [vmem:[%s3585_s4 + $0x298] sm:$0xff]  ;;  %v1106_v41 = vld [vmem:[%s3585_s4 + $0x290] sm:$0xff] }
  0xd4   : > { %v637_v25 = vadd.f32 %v2784_v49, %v614_v11  ;;  %1403 = vmatpush.msrb.mxu2 %v1134_v42  ;;  %v1149_v49 = vld [vmem:[%s3585_s4 + $0x3e8] sm:$0xff]  ;;  %v1122_v42 = vld [vmem:[%s3585_s4 + $0x310] sm:$0xff] }
  0xd5   : > { %1381 = vmatpush.msrb.mxu1 %v1117_v46  ;;  %1427 = vmatpush.msrb.mxu3 %v1149_v49  ;;  %v1089_v11 = vld [vmem:[%s3585_s4 + $0x208] sm:$0xff]  ;;  %v1138_v44 = vld [vmem:[%s3585_s4 + $0x390] sm:$0xff] }
  0xd6   : > { %v656_v9 = vpop.f32.mrf.mxu0  ;;  %1404 = vmatpush.msrb.mxu2 %v1133_v47  ;;  %1364 = vmatpush.msrb.mxu0 %v1095_v50  ;;  %v1105_v46 = vld [vmem:[%s3585_s4 + $0x288] sm:$0xff]  ;;  %v1104_v50 = vld [vmem:[%s3585_s4 + $0x280] sm:$0xff] }
  0xd7   : > { %v657_v15 = vadd.f32 %v656_v9, %v634_v54  ;;  %v1148_v54 = vld [vmem:[%s3585_s4 + $0x3e0] sm:$0xff]  ;;  %1382 = vmatpush.msrb.mxu1 %v1116_v51  ;;  %v1121_v47 = vld [vmem:[%s3585_s4 + $0x308] sm:$0xff] }
  0xd8   : > { %1405 = vmatpush.msrb.mxu2 %v1132_v52  ;;  %1428 = vmatpush.msrb.mxu3 %v1148_v54  ;;  %v1120_v51 = vld [vmem:[%s3585_s4 + $0x300] sm:$0xff]  ;;  %v1167_v54 = vld [vmem:[%s3585_s4 + $0x478] sm:$0xff] }
  0xd9   : > { %v679_v1 = vpop.f32.mrf.mxu1  ;;  %v702_v2 = vpop.f32.mrf.mxu2  ;;  %1365 = vmatpush.msrb.mxu0 %v1094_v55  ;;  %1383 = vmatpush.msrb.mxu1 %v1115_v56  ;;  %v1136_v52 = vld [vmem:[%s3585_s4 + $0x380] sm:$0xff]  ;;  %v1165_v56 = vld [vmem:[%s3585_s4 + $0x468] sm:$0xff] }
  0xda   : > { %v680_v30 = vadd.f32 %v679_v1, %v657_v15  ;;  %v1147_v15 = vld [vmem:[%s3585_s4 + $0x3d8] sm:$0xff]  ;;  %1406 = vmatpush.msrb.mxu2 %v1131_v58  ;;  %v1146_v1 = vld [vmem:[%s3585_s4 + $0x3d0] sm:$0xff]  ;;  %v1164_v58 = vld [vmem:[%s3585_s4 + $0x460] sm:$0xff] }
  0xdb   : > { %1429 = vmatpush.msrb.mxu3 %v1147_v15  ;;  %1366 = vmatpush.msrb.mxu0 %v1093_v60 }
  0xdc   : > { %v703_v31 = vadd.f32 %v702_v2, %v680_v30  ;;  %v725_v57 = vpop.f32.mrf.mxu3  ;;  %v1092_v2 = vld [vmem:[%s3585_s4 + $0x220] sm:$0xff]  ;;  %1384 = vmatpush.msrb.mxu1 %v1114_v20  ;;  %1407 = vmatpush.msrb.mxu2 %v1130_v61  ;;  %v1162_v61 = vld [vmem:[%s3585_s4 + $0x450] sm:$0xff] }
  0xdd   : > { %1430 = vmatpush.msrb.mxu3 %v1146_v1  ;;  %1367 = vmatpush.msrb.mxu0 %v1092_v2 }
  0xde   : > { %v2850_v6 = vadd.f32 %v725_v57, %v703_v31  ;;  %1385 = vmatpush.msrb.mxu1 %v1113_v4  ;;  %1408 = vmatpush.msrb.mxu2 %v1129_v26  ;;  %v1112_v31 = vld [vmem:[%s3585_s4 + $0x2c0] sm:$0xff] }
  0xdf   : > { %1431 = vmatpush.msrb.mxu3 %v1145_v12  ;;  %1368 = vmatpush.msrb.mxu0 %v1091_v24  ;;  %v1128_v57 = vld [vmem:[%s3585_s4 + $0x340] sm:$0xff]  ;;  %v1199_v12 = vld [vmem:[%s3585_s4 + $0x578] sm:$0xff]  ;;  %v1161_v24 = vld [vmem:[%s3585_s4 + $0x448] sm:$0xff] }
  0xe0   : > { %1386 = vmatpush.msrb.mxu1 %v1112_v31  ;;  %1409 = vmatpush.msrb.mxu2 %v1128_v57  ;;  %v1182_v31 = vld [vmem:[%s3585_s4 + $0x4f0] sm:$0xff] }
  0xe1   : > { %1432 = vmatpush.msrb.mxu3 %v1144_v28  ;;  %1369 = vmatpush.msrb.mxu0 %v1090_v53  ;;  %v1198_v57 = vld [vmem:[%s3585_s4 + $0x570] sm:$0xff] }
  0xe2   : > { %1410 = vmatpush.msrb.mxu2 %v1127_v0  ;;  %v1214_v28 = vld [vmem:[%s3585_s4 + $0x5f0] sm:$0xff] }
  0xe3   : > { %1433 = vmatpush.msrb.mxu3 %v1143_v8  ;;  %1370 = vmatpush.msrb.mxu0 %v1089_v11  ;;  %v1213_v8 = vld [vmem:[%s3585_s4 + $0x5e8] sm:$0xff]  ;;  %v1159_v11 = vld [vmem:[%s3585_s4 + $0x438] sm:$0xff] }
  0xe4   : > { %1411 = vmatpush.msrb.mxu2 %v1126_v14 }
  0xe5   : > { %1434 = vmatpush.msrb.mxu3 %v1142_v16  ;;  %1371 = vmatpush.msrb.mxu0 %v1088_v21  ;;  %v1196_v21 = vld [vmem:[%s3585_s4 + $0x560] sm:$0xff] }
  0xe7   : > { %v659_v23 = vpop.f32.mrf.mxu0  ;;  %1435 = vmatpush.msrb.mxu3 %v1141_v27 }
  0xe8   : > { %v660_v39 = vadd.f32 %v659_v23, %v637_v25  ;;  %v1125_v25 = vld [vmem:[%s3585_s4 + $0x328] sm:$0xff]  ;;  %v1124_v23 = vld [vmem:[%s3585_s4 + $0x320] sm:$0xff] }
  0xe9   : > { %1412 = vmatpush.msrb.mxu2 %v1125_v25  ;;  %1436 = vmatpush.msrb.mxu3 %v1140_v36  ;;  %v1158_v25 = vld [vmem:[%s3585_s4 + $0x430] sm:$0xff]  ;;  %v1211_v36 = vld [vmem:[%s3585_s4 + $0x5d8] sm:$0xff] }
  0xea   : > { %v682_v45 = vpop.f32.mrf.mxu1 }
  0xeb   : > { %v683_v48 = vadd.f32 %v682_v45, %v660_v39  ;;  %1413 = vmatpush.msrb.mxu2 %v1124_v23  ;;  %v1123_v39 = vld [vmem:[%s3585_s4 + $0x318] sm:$0xff]  ;;  %1437 = vmatpush.msrb.mxu3 %v1139_v35  ;;  %v1210_v35 = vld [vmem:[%s3585_s4 + $0x5d0] sm:$0xff] }
  0xec   : > { %v1195_v23 = vld [vmem:[%s3585_s4 + $0x558] sm:$0xff] }
  0xed   : > { %1414 = vmatpush.msrb.mxu2 %v1123_v39  ;;  %1438 = vmatpush.msrb.mxu3 %v1138_v44  ;;  %v1194_v39 = vld [vmem:[%s3585_s4 + $0x550] sm:$0xff]  ;;  %v1209_v44 = vld [vmem:[%s3585_s4 + $0x5c8] sm:$0xff] }
  0xee   : > { %v705_v9 = vpop.f32.mrf.mxu2 }
  0xef   : > { %v706_v59 = vadd.f32 %v705_v9, %v683_v48  ;;  %1415 = vmatpush.msrb.mxu2 %v1122_v42  ;;  %v1137_v48 = vld [vmem:[%s3585_s4 + $0x388] sm:$0xff]  ;;  %v1166_v9 = vld [vmem:[%s3585_s4 + $0x470] sm:$0xff] }
  0xf0   : > { %1439 = vmatpush.msrb.mxu3 %v1137_v48  ;;  %v1177_v42 = vld [vmem:[%s3585_s4 + $0x4c8] sm:$0xff] }
  0xf1   : > { %v728_v62 = vpop.f32.mrf.mxu3  ;;  %v748_v63 = vpop.f32.mrf.mxu0  ;;  %1416 = vmatpush.msrb.mxu2 %v1121_v47 }
  0xf2   : > { %v729_v3 = vadd.f32 %v728_v62, %v706_v59  ;;  %v749_v30 = vadd.f32 %v748_v63, %v2850_v6  ;;  %v1111_v6 = vld [vmem:[%s3585_s4 + $0x2b8] sm:$0xff]  ;;  %1440 = vmatpush.msrb.mxu3 %v1136_v52 }
  0xf3   : > { %1387 = vmatpush.msrb.mxu1 %v1111_v6  ;;  %1417 = vmatpush.msrb.mxu2 %v1120_v51  ;;  %v1163_v59 = vld [vmem:[%s3585_s4 + $0x458] sm:$0xff]  ;;  %v1197_v6 = vld [vmem:[%s3585_s4 + $0x568] sm:$0xff]  ;;  %v1208_v51 = vld [vmem:[%s3585_s4 + $0x5c0] sm:$0xff] }
  0xf5   : > { %v771_v17 = vpop.f32.mrf.mxu1  ;;  %1388 = vmatpush.msrb.mxu1 %v1110_v13  ;;  %v1180_v13 = vld [vmem:[%s3585_s4 + $0x4e0] sm:$0xff] }
  0xf6   : > { %v772_v34 = vadd.f32 %v771_v17, %v749_v30  ;;  %v1183_v30 = vld [vmem:[%s3585_s4 + $0x4f8] sm:$0xff] }
  0xf7   : > { %1389 = vmatpush.msrb.mxu1 %v1109_v22  ;;  %v1215_v17 = vld [vmem:[%s3585_s4 + $0x5f8] sm:$0xff]  ;;  %v1212_v22 = vld [vmem:[%s3585_s4 + $0x5e0] sm:$0xff] }
  0xf8   : > { %v794_v5 = vpop.f32.mrf.mxu2 }
  0xf9   : > { %v795_v10 = vadd.f32 %v794_v5, %v772_v34  ;;  %1390 = vmatpush.msrb.mxu1 %v1108_v33  ;;  %v1160_v34 = vld [vmem:[%s3585_s4 + $0x440] sm:$0xff]  ;;  %v1181_v5 = vld [vmem:[%s3585_s4 + $0x4e8] sm:$0xff]  ;;  %v1179_v33 = vld [vmem:[%s3585_s4 + $0x4d8] sm:$0xff] }
  0xfa   : > { %v817_v7 = vpop.f32.mrf.mxu3 }
  0xfb   : > { %v751_v18 = vpop.f32.mrf.mxu0  ;;  %v3020_v19 = vadd.f32 %v817_v7, %v795_v10  ;;  %1391 = vmatpush.msrb.mxu1 %v1107_v38  ;;  %v1178_v38 = vld [vmem:[%s3585_s4 + $0x4d0] sm:$0xff] }
  0xfc   : > { %v752_v29 = vadd.f32 %v751_v18, %v729_v3 }
  0xfd   : > { %1392 = vmatpush.msrb.mxu1 %v1106_v41 }
  0xfe   : > { %v774_v32 = vpop.f32.mrf.mxu1 }
  0xff   : > { %v775_v37 = vadd.f32 %v774_v32, %v752_v29  ;;  %1393 = vmatpush.msrb.mxu1 %v1105_v46  ;;  %v1176_v46 = vld [vmem:[%s3585_s4 + $0x4c0] sm:$0xff] }
 0x101   : > { %1394 = vmatpush.msrb.mxu1 %v1104_v50  ;;  %v1192_v50 = vld [vmem:[%s3585_s4 + $0x540] sm:$0xff] }
 0x102   : > { %v797_v40 = vpop.f32.mrf.mxu2 }
 0x103   : > { %v798_v43 = vadd.f32 %v797_v40, %v775_v37  ;;  %v1157_v37 = vld [vmem:[%s3585_s4 + $0x428] sm:$0xff]  ;;  %v1156_v40 = vld [vmem:[%s3585_s4 + $0x420] sm:$0xff] }
 0x105   : > { %v820_v45 = vpop.f32.mrf.mxu3 }
 0x106   : > { %v3070_v49 = vadd.f32 %v820_v45, %v798_v43  ;;  %v1193_v43 = vld [vmem:[%s3585_s4 + $0x548] sm:$0xff]  ;;  %v1155_v45 = vld [vmem:[%s3585_s4 + $0x418] sm:$0xff] }
 0x11c   : > { %v3084_v55 = vpop.f32.mrf.mxu3 }
 0x11d   : > { %1280 = vmatmul.f32.vlgmr.msra.gmra.mxu0 %v3084_v55  ;;  %v956_v60 = vrot.slane %v3084_v55, 1  ;;  %v963_v20 = vrot.slane %v3084_v55, 2  ;;  %v970_v1 = vrot.slane %v3084_v55, 3  ;;  %v977_v10 = vrot.slane %v3084_v55, 4 }
 0x11e   : > { %1448 = vmatpush.msra.mxu0 %v1167_v54 }
 0x120   : > { %1449 = vmatpush.msra.mxu0 %v1166_v9  ;;  %v1154_v9 = vld [vmem:[%s3585_s4 + $0x410] sm:$0xff] }
 0x122   : > { %1450 = vmatpush.msra.mxu0 %v1165_v56  ;;  %v984_v56 = vrot.slane %v3084_v55, 5 }
 0x124   : > { %1451 = vmatpush.msra.mxu0 %v1164_v58  ;;  %v3099_v15 = vpop.f32.mrf.mxu3  ;;  %v991_v58 = vrot.slane %v3084_v55, 6 }
 0x125   : > { %1283 = vmatmul.f32.gmra.mxu0 %v3099_v15  ;;  %v957_v62 = vrot.slane %v3099_v15, 1  ;;  %v964_v63 = vrot.slane %v3099_v15, 2  ;;  %v971_v2 = vrot.slane %v3099_v15, 3  ;;  %v978_v53 = vrot.slane %v3099_v15, 4 }
 0x126   : > { %1452 = vmatpush.msra.mxu0 %v1163_v59  ;;  %v985_v47 = vrot.slane %v3099_v15, 5  ;;  %v992_v52 = vrot.slane %v3099_v15, 6  ;;  %v999_v54 = vrot.slane %v3099_v15, 7  ;;  %v998_v59 = vrot.slane %v3084_v55, 7  ;;  %v1207_v55 = vld [vmem:[%s3585_s4 + $0x5b8] sm:$0xff] }
 0x127   : > { %v958_v3 = vsel %vm232_vm2, %v956_v60, %v957_v62  ;;  %v965_v4 = vsel %vm240_vm0, %v963_v20, %v964_v63  ;;  %v972_v26 = vsel %vm248_vm1, %v970_v1, %v971_v2  ;;  %v979_v18 = vsel %vm256_vm4, %v977_v10, %v978_v53  ;;  %v1175_v20 = vld [vmem:[%s3585_s4 + $0x4b8] sm:$0xff]  ;;  %v1153_v1 = vld [vmem:[%s3585_s4 + $0x408] sm:$0xff] }
 0x128   : > { %1453 = vmatpush.msra.mxu0 %v1162_v61  ;;  %1303 = vmatmul.f32.vlgmr.msra.gmra.mxu1 %v958_v3  ;;  %v986_v60 = vsel %vm264_vm6, %v984_v56, %v985_v47  ;;  %v1191_v61 = vld [vmem:[%s3585_s4 + $0x538] sm:$0xff]  ;;  %v1190_v3 = vld [vmem:[%s3585_s4 + $0x530] sm:$0xff]  ;;  %v1245_v56 = vld [vmem:[%s3585_s4 + $0x6e8] sm:$0xff] }
 0x129   : > { %1326 = vmatmul.f32.vlgmr.msra.gmra.mxu2 %v965_v4  ;;  %1349 = vmatmul.f32.vlgmr.msra.gmra.mxu3 %v972_v26  ;;  %v1206_v4 = vld [vmem:[%s3585_s4 + $0x5b0] sm:$0xff]  ;;  %v1152_v26 = vld [vmem:[%s3585_s4 + $0x400] sm:$0xff]  ;;  %v1171_v10 = vld [vmem:[%s3585_s4 + $0x498] sm:$0xff] }
 0x12a   : > { %1471 = vmatpush.msra.mxu1 %v1183_v30  ;;  %1494 = vmatpush.msra.mxu2 %v1199_v12  ;;  %v1173_v30 = vld [vmem:[%s3585_s4 + $0x4a8] sm:$0xff] }
 0x12b   : > { %1517 = vmatpush.msra.mxu3 %v1215_v17  ;;  %1454 = vmatpush.msra.mxu0 %v1161_v24  ;;  %v1189_v12 = vld [vmem:[%s3585_s4 + $0x528] sm:$0xff]  ;;  %v1231_v24 = vld [vmem:[%s3585_s4 + $0x678] sm:$0xff] }
 0x12c   : > { %1472 = vmatpush.msra.mxu1 %v1182_v31  ;;  %1495 = vmatpush.msra.mxu2 %v1198_v57  ;;  %v3145_v0 = vpop.f32.mrf.mxu3  ;;  %v1205_v17 = vld [vmem:[%s3585_s4 + $0x5a8] sm:$0xff]  ;;  %v1172_v31 = vld [vmem:[%s3585_s4 + $0x4a0] sm:$0xff] }
 0x12d   : > { %1518 = vmatpush.msra.mxu3 %v1214_v28  ;;  %1455 = vmatpush.msra.mxu0 %v1160_v34  ;;  %v959_v14 = vrot.slane %v3145_v0, 1  ;;  %v966_v7 = vrot.slane %v3145_v0, 2  ;;  %v973_v16 = vrot.slane %v3145_v0, 3  ;;  %v980_v41 = vrot.slane %v3145_v0, 4  ;;  %v1188_v28 = vld [vmem:[%s3585_s4 + $0x520] sm:$0xff] }
 0x12e   : > { %1473 = vmatpush.msra.mxu1 %v1181_v5  ;;  %1496 = vmatpush.msra.mxu2 %v1197_v6  ;;  %v987_v57 = vrot.slane %v3145_v0, 5  ;;  %v1204_v34 = vld [vmem:[%s3585_s4 + $0x5a0] sm:$0xff]  ;;  %v1001_v5 = vrot.slane %v3145_v0, 7  ;;  %v1230_v6 = vld [vmem:[%s3585_s4 + $0x670] sm:$0xff] }
 0x12f   : > { %1519 = vmatpush.msra.mxu3 %v1213_v8  ;;  %1372 = vmatmul.f32.vlgmr.msrb.gmra.mxu0 %v979_v18  ;;  %v3173_v27 = vsel %vm232_vm2, %v957_v62, %v959_v14  ;;  %v3178_v29 = vsel %vm240_vm0, %v964_v63, %v966_v7  ;;  %v3183_v32 = vsel %vm248_vm1, %v971_v2, %v973_v16  ;;  %v1174_v2 = vld [vmem:[%s3585_s4 + $0x4b0] sm:$0xff]  ;;  %v1203_v18 = vld [vmem:[%s3585_s4 + $0x598] sm:$0xff] }
 0x130   : > { %1456 = vmatpush.msra.mxu0 %v1159_v11  ;;  %1474 = vmatpush.msra.mxu1 %v1180_v13  ;;  %v3232_v48 = vsel %vm256_vm4, %v978_v53, %v980_v41  ;;  %v993_v62 = vsel %vm272_vm3, %v991_v58, %v992_v52  ;;  %v1000_v63 = vsel %vm280_vm5, %v998_v59, %v999_v54  ;;  %v994_v53 = vrot.slane %v3145_v0, 6  ;;  %v1187_v11 = vld [vmem:[%s3585_s4 + $0x518] sm:$0xff]  ;;  %v1260_v59 = vld [vmem:[%s3585_s4 + $0x760] sm:$0xff] }
 0x131   : > { %1497 = vmatpush.msra.mxu2 %v1196_v21  ;;  %1520 = vmatpush.msra.mxu3 %v1212_v22  ;;  %v3307_v8 = vsel %vm264_vm6, %v985_v47, %v987_v57  ;;  %v1002_v13 = vsel %vm280_vm5, %v999_v54, %v1001_v5  ;;  %v1229_v21 = vld [vmem:[%s3585_s4 + $0x668] sm:$0xff]  ;;  %v1170_v22 = vld [vmem:[%s3585_s4 + $0x490] sm:$0xff]  ;;  %v1224_v54 = vld [vmem:[%s3585_s4 + $0x640] sm:$0xff] }
 0x132   : > { %1457 = vmatpush.msra.mxu0 %v1158_v25  ;;  %1306 = vmatmul.f32.gmra.mxu1 %v3173_v27  ;;  %v1186_v25 = vld [vmem:[%s3585_s4 + $0x510] sm:$0xff]  ;;  %v1225_v47 = vld [vmem:[%s3585_s4 + $0x648] sm:$0xff]  ;;  %v1223_v58 = vld [vmem:[%s3585_s4 + $0x638] sm:$0xff] }
 0x133   : > { %1329 = vmatmul.f32.gmra.mxu2 %v3178_v29  ;;  %1352 = vmatmul.f32.gmra.mxu3 %v3183_v32  ;;  %v1256_v5 = vld [vmem:[%s3585_s4 + $0x740] sm:$0xff] }
 0x134   : > { %1475 = vmatpush.msra.mxu1 %v1179_v33  ;;  %1498 = vmatpush.msra.mxu2 %v1195_v23  ;;  %v1202_v33 = vld [vmem:[%s3585_s4 + $0x590] sm:$0xff]  ;;  %v1228_v23 = vld [vmem:[%s3585_s4 + $0x660] sm:$0xff] }
 0x135   : > { %1521 = vmatpush.msra.mxu3 %v1211_v36  ;;  %1458 = vmatpush.msra.mxu0 %v1157_v37  ;;  %v1169_v36 = vld [vmem:[%s3585_s4 + $0x488] sm:$0xff] }
 0x136   : > { %1476 = vmatpush.msra.mxu1 %v1178_v38  ;;  %1499 = vmatpush.msra.mxu2 %v1194_v39  ;;  %v1185_v37 = vld [vmem:[%s3585_s4 + $0x508] sm:$0xff]  ;;  %v1227_v39 = vld [vmem:[%s3585_s4 + $0x658] sm:$0xff] }
 0x137   : > { %1522 = vmatpush.msra.mxu3 %v1210_v35  ;;  %1459 = vmatpush.msra.mxu0 %v1156_v40  ;;  %v1201_v38 = vld [vmem:[%s3585_s4 + $0x588] sm:$0xff]  ;;  %v1168_v35 = vld [vmem:[%s3585_s4 + $0x480] sm:$0xff] }
 0x138   : > { %1477 = vmatpush.msra.mxu1 %v1177_v42  ;;  %1500 = vmatpush.msra.mxu2 %v1193_v43  ;;  %v1184_v40 = vld [vmem:[%s3585_s4 + $0x500] sm:$0xff]  ;;  %v1226_v43 = vld [vmem:[%s3585_s4 + $0x650] sm:$0xff] }
 0x139   : > { %1523 = vmatpush.msra.mxu3 %v1209_v44  ;;  %1375 = vmatmul.f32.gmra.mxu0 %v3232_v48  ;;  %v1200_v42 = vld [vmem:[%s3585_s4 + $0x580] sm:$0xff]  ;;  %v1247_v44 = vld [vmem:[%s3585_s4 + $0x6f8] sm:$0xff] }
 0x13a   : > { %1460 = vmatpush.msra.mxu0 %v1155_v45  ;;  %1478 = vmatpush.msra.mxu1 %v1176_v46  ;;  %v1263_v45 = vld [vmem:[%s3585_s4 + $0x778] sm:$0xff] }
 0x13b   : > { %1501 = vmatpush.msra.mxu2 %v1192_v50  ;;  %1524 = vmatpush.msra.mxu3 %v1208_v51  ;;  %v907_v46 = vld [vmem:[%s3583_s2 + $0x78] sm:$0xff]  ;;  %v1246_v50 = vld [vmem:[%s3585_s4 + $0x6f0] sm:$0xff] }
 0x13c   : > { %1461 = vmatpush.msra.mxu0 %v1154_v9  ;;  %1395 = vmatmul.f32.vlgmr.msrb.gmra.mxu1 %v986_v60  ;;  %v1262_v51 = vld [vmem:[%s3585_s4 + $0x770] sm:$0xff]  ;;  %v3392_v9 = vpop.f32.mrf.mxu3  ;;  %v904_v60 = vld [vmem:[%s3583_s2 + $0x60] sm:$0xff] }
 0x13d   : > { %1418 = vmatmul.f32.vlgmr.msrb.gmra.mxu2 %v993_v62  ;;  %1441 = vmatmul.f32.vlgmr.msrb.gmra.mxu3 %v1000_v63  ;;  %v1243_v62 = vld [vmem:[%s3585_s4 + $0x6d8] sm:$0xff] }
 0x13e   : > { %1479 = vmatpush.msra.mxu1 %v1175_v20  ;;  %1502 = vmatpush.msra.mxu2 %v1191_v61  ;;  %v1222_v20 = vld [vmem:[%s3585_s4 + $0x630] sm:$0xff]  ;;  %v1006_v61 = vrot.slane %v3392_v9, 1  ;;  %v1259_v63 = vld [vmem:[%s3585_s4 + $0x758] sm:$0xff] }
 0x13f   : > { %1525 = vmatpush.msra.mxu3 %v1207_v55  ;;  %1462 = vmatpush.msra.mxu0 %v1153_v1  ;;  %v1009_v55 = vrot.slane %v3392_v9, 2  ;;  %v1012_v1 = vrot.slane %v3392_v9, 3 }
 0x140   : > { %1480 = vmatpush.msra.mxu1 %v1174_v2  ;;  %1503 = vmatpush.msra.mxu2 %v1190_v3  ;;  %v903_v2 = vld [vmem:[%s3583_s2 + $0x58] sm:$0xff]  ;;  %v1007_v3 = vsel %vm232_vm2, %v959_v14, %v1006_v61  ;;  %v1258_v14 = vld [vmem:[%s3585_s4 + $0x750] sm:$0xff] }
 0x141   : > { %1526 = vmatpush.msra.mxu3 %v1206_v4  ;;  %1463 = vmatpush.msra.mxu0 %v1152_v26  ;;  %v1221_v4 = vld [vmem:[%s3585_s4 + $0x628] sm:$0xff]  ;;  %v1242_v26 = vld [vmem:[%s3585_s4 + $0x6d0] sm:$0xff] }
 0x142   : > { %1481 = vmatpush.msra.mxu1 %v1173_v30  ;;  %1504 = vmatpush.msra.mxu2 %v1189_v12  ;;  %v1010_v30 = vsel %vm240_vm0, %v966_v7, %v1009_v55  ;;  %v1013_v12 = vsel %vm248_vm1, %v973_v16, %v1012_v1  ;;  %v1241_v7 = vld [vmem:[%s3585_s4 + $0x6c8] sm:$0xff]  ;;  %v1021_v55 = vrot.slane %v3392_v9, 6 }
 0x143   : > { %1527 = vmatpush.msra.mxu3 %v1205_v17  ;;  %1540 = vmatpush.msrb.mxu0 %v1231_v24  ;;  %v902_v17 = vld [vmem:[%s3583_s2 + $0x50] sm:$0xff]  ;;  %v1220_v24 = vld [vmem:[%s3585_s4 + $0x620] sm:$0xff]  ;;  %v1257_v16 = vld [vmem:[%s3585_s4 + $0x748] sm:$0xff] }
 0x144   : > { %1464 = vmatmul.f32.vlgmr.msra.gmra.mxu0 %v3099_v15  ;;  %1482 = vmatpush.msra.mxu1 %v1172_v31  ;;  %v3319_v15 = vsel %vm272_vm3, %v992_v52, %v994_v53  ;;  %v906_v52 = vld [vmem:[%s3583_s2 + $0x70] sm:$0xff]  ;;  %v901_v31 = vld [vmem:[%s3583_s2 + $0x48] sm:$0xff] }
 0x145   : > { %1505 = vmatpush.msra.mxu2 %v1188_v28  ;;  %1528 = vmatpush.msra.mxu3 %v1204_v34  ;;  %v1219_v28 = vld [vmem:[%s3585_s4 + $0x618] sm:$0xff]  ;;  %v1240_v34 = vld [vmem:[%s3585_s4 + $0x6c0] sm:$0xff] }
 0x146   : > { %1541 = vmatpush.msrb.mxu0 %v1230_v6  ;;  %1398 = vmatmul.f32.gmra.mxu1 %v3307_v8  ;;  %v900_v6 = vld [vmem:[%s3583_s2 + $0x40] sm:$0xff] }
 0x147   : > { %1421 = vmatmul.f32.gmra.mxu2 %v3319_v15  ;;  %1444 = vmatmul.f32.gmra.mxu3 %v1002_v13  ;;  %v1255_v13 = vld [vmem:[%s3585_s4 + $0x738] sm:$0xff] }
 0x148   : > { %1483 = vmatpush.msra.mxu1 %v1171_v10  ;;  %1506 = vmatpush.msra.mxu2 %v1187_v11  ;;  %v1218_v10 = vld [vmem:[%s3585_s4 + $0x610] sm:$0xff]  ;;  %v1239_v11 = vld [vmem:[%s3585_s4 + $0x6b8] sm:$0xff] }
 0x149   : > { %1529 = vmatpush.msra.mxu3 %v1203_v18  ;;  %1542 = vmatpush.msrb.mxu0 %v1229_v21  ;;  %v899_v18 = vld [vmem:[%s3583_s2 + $0x38] sm:$0xff]  ;;  %v1217_v21 = vld [vmem:[%s3585_s4 + $0x608] sm:$0xff] }
 0x14a   : > { %1484 = vmatpush.msra.mxu1 %v1170_v22  ;;  %1507 = vmatpush.msra.mxu2 %v1186_v25  ;;  %v1238_v22 = vld [vmem:[%s3585_s4 + $0x6b0] sm:$0xff] }
 0x14b   : > { %1530 = vmatpush.msra.mxu3 %v1202_v33  ;;  %1543 = vmatpush.msrb.mxu0 %v1228_v23  ;;  %v1254_v25 = vld [vmem:[%s3585_s4 + $0x730] sm:$0xff]  ;;  %v1216_v23 = vld [vmem:[%s3585_s4 + $0x600] sm:$0xff] }
 0x14c   : > { %1485 = vmatpush.msra.mxu1 %v1169_v36  ;;  %1508 = vmatpush.msra.mxu2 %v1185_v37  ;;  %v898_v33 = vld [vmem:[%s3583_s2 + $0x30] sm:$0xff]  ;;  %v1237_v36 = vld [vmem:[%s3585_s4 + $0x6a8] sm:$0xff] }
 0x14d   : > { %1531 = vmatpush.msra.mxu3 %v1201_v38  ;;  %1544 = vmatpush.msrb.mxu0 %v1227_v39  ;;  %v1253_v37 = vld [vmem:[%s3585_s4 + $0x728] sm:$0xff]  ;;  %v1236_v39 = vld [vmem:[%s3585_s4 + $0x6a0] sm:$0xff] }
 0x14e   : > { %1467 = vmatmul.f32.gmra.mxu0 %v3145_v0  ;;  %1486 = vmatpush.msra.mxu1 %v1168_v35  ;;  %v897_v38 = vld [vmem:[%s3583_s2 + $0x28] sm:$0xff]  ;;  %v840_v35 = vpop.f32.mrf.mxu0 }
 0x14f   : > { %1509 = vmatpush.msra.mxu2 %v1184_v40  ;;  %1532 = vmatpush.msra.mxu3 %v1200_v42  ;;  %v1252_v40 = vld [vmem:[%s3585_s4 + $0x720] sm:$0xff] }
 0x150   : > { %1545 = vmatpush.msrb.mxu0 %v1226_v43  ;;  %1563 = vmatpush.msrb.mxu1 %v1247_v44  ;;  %v896_v42 = vld [vmem:[%s3583_s2 + $0x20] sm:$0xff]  ;;  %v1235_v43 = vld [vmem:[%s3585_s4 + $0x698] sm:$0xff] }
 0x151   : > { %1586 = vmatpush.msrb.mxu2 %v1263_v45  ;;  %1609 = vmatpush.msrb.mxu3 %v907_v46  ;;  %v1251_v44 = vld [vmem:[%s3585_s4 + $0x718] sm:$0xff]  ;;  %v1234_v45 = vld [vmem:[%s3585_s4 + $0x690] sm:$0xff]  ;;  %v863_v46 = vpop.f32.mrf.mxu1 }
 0x152   : > { %1487 = vmatmul.f32.vlgmr.msra.gmra.mxu1 %v3173_v27  ;;  %1510 = vmatmul.f32.vlgmr.msra.gmra.mxu2 %v3178_v29  ;;  %v1261_v27 = vld [vmem:[%s3585_s4 + $0x768] sm:$0xff] }
 0x153   : > { %1533 = vmatmul.f32.vlgmr.msra.gmra.mxu3 %v3183_v32  ;;  %1546 = vmatpush.msrb.mxu0 %v1225_v47  ;;  %v905_v29 = vld [vmem:[%s3583_s2 + $0x68] sm:$0xff]  ;;  %v1244_v32 = vld [vmem:[%s3585_s4 + $0x6e0] sm:$0xff]  ;;  %v1250_v47 = vld [vmem:[%s3585_s4 + $0x710] sm:$0xff] }
 0x154   : > { %1564 = vmatpush.msrb.mxu1 %v1246_v50  ;;  %1587 = vmatpush.msrb.mxu2 %v1262_v51  ;;  %v1015_v50 = vrot.slane %v3392_v9, 4  ;;  %v841_v51 = vadd.f32 %v840_v35, %v3020_v19  ;;  %v893_v19 = vld [vmem:[%s3583_s2 + $0x8] sm:$0xff] }
 0x155   : > { %1610 = vmatpush.msrb.mxu3 %v906_v52  ;;  %1547 = vmatpush.msrb.mxu0 %v1224_v54  ;;  %v894_v52 = vld [vmem:[%s3583_s2 + $0x10] sm:$0xff]  ;;  %v1233_v54 = vld [vmem:[%s3585_s4 + $0x688] sm:$0xff] }
 0x156   : > { %1565 = vmatpush.msrb.mxu1 %v1245_v56  ;;  %1588 = vmatpush.msrb.mxu2 %v1261_v27  ;;  %v886_v56 = vpop.f32.mrf.mxu2  ;;  %v1249_v27 = vld [vmem:[%s3585_s4 + $0x708] sm:$0xff] }
 0x157   : > { %1611 = vmatpush.msrb.mxu3 %v905_v29  ;;  %1548 = vmatpush.msrb.mxu0 %v1223_v58  ;;  %v1232_v29 = vld [vmem:[%s3585_s4 + $0x680] sm:$0xff]  ;;  %v1016_v58 = vsel %vm256_vm4, %v980_v41, %v1015_v50 }
 0x158   : > { %1566 = vmatpush.msrb.mxu1 %v1244_v32  ;;  %1589 = vmatpush.msrb.mxu2 %v1260_v59  ;;  %v1248_v32 = vld [vmem:[%s3585_s4 + $0x700] sm:$0xff]  ;;  %v864_v59 = vadd.f32 %v863_v46, %v841_v51 }
 0x159   : > { %1612 = vmatpush.msrb.mxu3 %v904_v60  ;;  %1549 = vmatpush.msrb.mxu0 %v1222_v20  ;;  %v892_v60 = vld [vmem:[%s3583_s2] sm:$0xff]  ;;  %v843_v20 = vpop.f32.mrf.mxu0 }
 0x15a   : > { %1567 = vmatpush.msrb.mxu1 %v1243_v62  ;;  %1590 = vmatpush.msrb.mxu2 %v1259_v63  ;;  %v887_v61 = vadd.f32 %v886_v56, %v864_v59  ;;  %v844_v41 = vadd.f32 %v843_v20, %v3070_v49  ;;  %v866_v62 = vpop.f32.mrf.mxu1  ;;  %v1018_v63 = vrot.slane %v3392_v9, 5 }
 0x15b   : > { %1613 = vmatpush.msrb.mxu3 %v903_v2  ;;  %1490 = vmatmul.f32.gmra.mxu1 %v1007_v3 }
 0x15c   : > { %1513 = vmatmul.f32.gmra.mxu2 %v1010_v30  ;;  %1536 = vmatmul.f32.gmra.mxu3 %v1013_v12  ;;  %v867_v2 = vadd.f32 %v866_v62, %v844_v41  ;;  %v1019_v3 = vsel %vm264_vm6, %v987_v57, %v1018_v63 }
 0x15d   : > { %1550 = vmatpush.msrb.mxu0 %v1221_v4  ;;  %1568 = vmatpush.msrb.mxu1 %v1242_v26 }
 0x15e   : > { %1591 = vmatpush.msrb.mxu2 %v1258_v14  ;;  %1614 = vmatpush.msrb.mxu3 %v902_v17  ;;  %v889_v1 = vpop.f32.mrf.mxu2 }
 0x15f   : > { %1551 = vmatpush.msrb.mxu0 %v1220_v24  ;;  %1569 = vmatpush.msrb.mxu1 %v1241_v7  ;;  %v890_v4 = vadd.f32 %v889_v1, %v867_v2 }
 0x160   : > { %1592 = vmatpush.msrb.mxu2 %v1257_v16  ;;  %1615 = vmatpush.msrb.mxu3 %v901_v31 }
 0x161   : > { %1552 = vmatpush.msrb.mxu0 %v1219_v28  ;;  %1570 = vmatpush.msrb.mxu1 %v1240_v34 }
 0x162   : > { %1593 = vmatpush.msrb.mxu2 %v1256_v5  ;;  %1616 = vmatpush.msrb.mxu3 %v900_v6 }
 0x163   : > { %1553 = vmatpush.msrb.mxu0 %v1218_v10  ;;  %1571 = vmatpush.msrb.mxu1 %v1239_v11 }
 0x164   : > { %1594 = vmatpush.msrb.mxu2 %v1255_v13  ;;  %1617 = vmatpush.msrb.mxu3 %v899_v18 }
 0x165   : > { %1554 = vmatpush.msrb.mxu0 %v1217_v21  ;;  %1572 = vmatpush.msrb.mxu1 %v1238_v22 }
 0x166   : > { %1595 = vmatpush.msrb.mxu2 %v1254_v25  ;;  %1618 = vmatpush.msrb.mxu3 %v898_v33 }
 0x167   : > { %1555 = vmatpush.msrb.mxu0 %v1216_v23  ;;  %1573 = vmatpush.msrb.mxu1 %v1237_v36 }
 0x168   : > { %1556 = vmatmul.f32.vlgmr.msrb.gmra.mxu0 %v3232_v48  ;;  %1596 = vmatpush.msrb.mxu2 %v1253_v37  ;;  %v895_v48 = vld [vmem:[%s3583_s2 + $0x18] sm:$0xff] }
 0x169   : > { %1619 = vmatpush.msrb.mxu3 %v897_v38  ;;  %1574 = vmatpush.msrb.mxu1 %v1236_v39 }
 0x16a   : > { %1597 = vmatpush.msrb.mxu2 %v1252_v40 }
 0x16b   : > { %1620 = vmatpush.msrb.mxu3 %v896_v42  ;;  %1575 = vmatpush.msrb.mxu1 %v1235_v43 }
 0x16c   : > { %1598 = vmatpush.msrb.mxu2 %v1251_v44 }
 0x16d   : > { %1621 = vmatpush.msrb.mxu3 %v895_v48  ;;  %1576 = vmatpush.msrb.mxu1 %v1234_v45 }
 0x16e   : > { %1599 = vmatpush.msrb.mxu2 %v1250_v47 }
 0x16f   : > { %1622 = vmatpush.msrb.mxu3 %v894_v52  ;;  %1577 = vmatpush.msrb.mxu1 %v1233_v54 }
 0x170   : > { %1559 = vmatmul.f32.gmra.mxu0 %v1016_v58  ;;  %1600 = vmatpush.msrb.mxu2 %v1249_v27 }
 0x171   : > { %1623 = vmatpush.msrb.mxu3 %v893_v19  ;;  %1578 = vmatpush.msrb.mxu1 %v1232_v29 }
 0x172   : > { %1601 = vmatpush.msrb.mxu2 %v1248_v32  ;;  %1579 = vmatmul.f32.vlgmr.msrb.gmra.mxu1 %v3307_v8  ;;  %v1022_v8 = vsel %vm272_vm3, %v994_v53, %v1021_v55 }
 0x173   : > { %1624 = vmatpush.msrb.mxu3 %v892_v60  ;;  %1602 = vmatmul.f32.vlgmr.msrb.gmra.mxu2 %v3319_v15 }
 0x174   : > { %1625 = vmatmul.f32.vlgmr.msrb.gmra.mxu3 %v887_v61 }
 0x17a   : > { %1582 = vmatmul.f32.gmra.mxu1 %v1019_v3 }
 0x17b   : > { %1605 = vmatmul.f32.gmra.mxu2 %v1022_v8 }
 0x17c   : > { %1628 = vmatmul.f32.gmra.mxu3 %v890_v4 }
 0x19a   : > { %v1281_v49 = vpop.f32.mrf.mxu0 }
 0x1a2   : > { %v1284_v12 = vpop.f32.mrf.mxu0 }
 0x1a5   : > { %v1304_v15 = vpop.f32.mrf.mxu1 }
 0x1a6   : > { %v1305_v28 = vadd.f32 %v1304_v15, %v1281_v49 }
 0x1ac   : > { %v1327_v26 = vpop.f32.mrf.mxu2  ;;  %v1350_v30 = vpop.f32.mrf.mxu3 }
 0x1ad   : > { %v1373_v24 = vpop.f32.mrf.mxu0  ;;  %v1328_v0 = vadd.f32 %v1327_v26, %v1305_v28 }
 0x1af   : > { %v1307_v9 = vpop.f32.mrf.mxu1  ;;  %v1351_v5 = vadd.f32 %v1350_v30, %v1328_v0 }
 0x1b0   : > { %v1308_v6 = vadd.f32 %v1307_v9, %v1284_v12 }
 0x1b1   : > { %v1374_v18 = vadd.f32 %v1373_v24, %v1351_v5 }
 0x1b6   : > { %v1330_v14 = vpop.f32.mrf.mxu2  ;;  %v1353_v17 = vpop.f32.mrf.mxu3 }
 0x1b7   : > { %v1376_v31 = vpop.f32.mrf.mxu0  ;;  %v1331_v13 = vadd.f32 %v1330_v14, %v1308_v6 }
 0x1b9   : > { %v1396_v7 = vpop.f32.mrf.mxu1  ;;  %v1354_v25 = vadd.f32 %v1353_v17, %v1331_v13 }
 0x1ba   : > { %v1397_v22 = vadd.f32 %v1396_v7, %v1374_v18 }
 0x1bb   : > { %v1377_v37 = vadd.f32 %v1376_v31, %v1354_v25 }
 0x1c0   : > { %v1419_v16 = vpop.f32.mrf.mxu2  ;;  %v1442_v57 = vpop.f32.mrf.mxu3 }
 0x1c1   : > { %v1465_v11 = vpop.f32.mrf.mxu0  ;;  %v1420_v33 = vadd.f32 %v1419_v16, %v1397_v22 }
 0x1c3   : > { %v1399_v34 = vpop.f32.mrf.mxu1  ;;  %v1443_v36 = vadd.f32 %v1442_v57, %v1420_v33 }
 0x1c4   : > { %v1400_v35 = vadd.f32 %v1399_v34, %v1377_v37 }
 0x1c5   : > { %v1466_v43 = vadd.f32 %v1465_v11, %v1443_v36 }
 0x1ca   : > { %v1422_v53 = vpop.f32.mrf.mxu2  ;;  %v1445_v10 = vpop.f32.mrf.mxu3 }
 0x1cb   : > { %v1468_v39 = vpop.f32.mrf.mxu0  ;;  %v1423_v42 = vadd.f32 %v1422_v53, %v1400_v35 }
 0x1cd   : > { %v1446_v48 = vadd.f32 %v1445_v10, %v1423_v42 }
 0x1cf   : > { %v1488_v21 = vpop.f32.mrf.mxu1  ;;  %v1469_v54 = vadd.f32 %v1468_v39, %v1446_v48 }
 0x1d0   : > { %v1489_v44 = vadd.f32 %v1488_v21, %v1466_v43 }
 0x1d5   : > { %v1511_v23 = vpop.f32.mrf.mxu2 }
 0x1d6   : > { %v1534_v38 = vpop.f32.mrf.mxu3  ;;  %v1512_v45 = vadd.f32 %v1511_v23, %v1489_v44 }
 0x1d8   : > { %v1491_v40 = vpop.f32.mrf.mxu1  ;;  %v1535_v52 = vadd.f32 %v1534_v38, %v1512_v45 }
 0x1d9   : > { %v1492_v56 = vadd.f32 %v1491_v40, %v1469_v54 }
 0x1df   : > { %v1514_v46 = vpop.f32.mrf.mxu2  ;;  %v1537_v50 = vpop.f32.mrf.mxu3 }
 0x1e0   : > { %v1515_v19 = vadd.f32 %v1514_v46, %v1492_v56 }
 0x1e2   : > { %v1538_v20 = vadd.f32 %v1537_v50, %v1515_v19 }
 0x1e5   : > { %v1557_v47 = vpop.f32.mrf.mxu0 }
 0x1e6   : > { %v1558_v27 = vadd.f32 %v1557_v47, %v1535_v52 }
 0x1ed   : > { %v1560_v60 = vpop.f32.mrf.mxu0 }
 0x1ee   : > { %v1561_v62 = vadd.f32 %v1560_v60, %v1538_v20 }
 0x1ef   : > { %v1580_v51 = vpop.f32.mrf.mxu1 }
 0x1f0   : > { %v1581_v29 = vadd.f32 %v1580_v51, %v1558_v27 }
 0x1f6   : > { %v1603_v58 = vpop.f32.mrf.mxu2 }
 0x1f7   : > { %v1604_v32 = vadd.f32 %v1603_v58, %v1581_v29  ;;  %v1626_v59 = vpop.f32.mrf.mxu3  ;;  %v1583_v41 = vpop.f32.mrf.mxu1 }
 0x1f8   : > { %v1584_v63 = vadd.f32 %v1583_v41, %v1561_v62 }
 0x1f9   : > { %v1627_v61 = vadd.f32 %v1626_v59, %v1604_v32 }
 0x1fb   : > { %1632 = vst [vmem:[%s224_s26] sm:$0xff] %v1627_v61 }
 0x1fe   : > { %v1606_v55 = vpop.f32.mrf.mxu2 }
 0x1ff   : > { %v1607_v1 = vadd.f32 %v1606_v55, %v1584_v63  ;;  %v1629_v2 = vpop.f32.mrf.mxu3 }
 0x201   : > { %v1630_v3 = vadd.f32 %v1629_v2, %v1607_v1 }
 0x203   : > { %1633 = vst [vmem:[%s224_s26 + $0x8] sm:$0xff] %v1630_v3 }
 0x204 PF: > { %s15_s18 = sadd.s32 1, %s1716_s18  }
 0x205   : > { %p12_p4 = scmp.ge.s32.totalorder %s15_s18, 4  }
 0x207   :  { %14 = sbr.rel (!%p12_p4) target bundleno = 1 (0x1), region = 70 }

</bundles_post_ra>
